<compile_context>
chip_gen: v5e
topology: v5e:2x2
jax: 0.10.0
libtpu: 0.0.40
codegen_flags: <defaults>
</compile_context>

<pallas_src>
import functools
import math

import jax
import jax.numpy as jnp
from jax.experimental import pallas as pl
from jax.experimental.pallas import tpu as pltpu


# ----------------------------------------------------------------------------
# Fused Pallas kernel: conv1 -> conv2 -> conv3 -> max-pool -> lin1 -> softmaxes
# One grid step == one graph.
# ----------------------------------------------------------------------------
def _gcncat_fused_kernel(a_ref, x_ref, w1_ref, b1_ref, w2_ref, b2_ref,
                         w3a_ref, w3b_ref, b3_ref, wl_ref, bl_ref,
                         logp_ref, pred_ref, crit_ref, agg_ref,
                         *, n_per_batch):
    f32, bf = jnp.float32, jnp.bfloat16
    a = a_ref[0]                                    # [n, n]   bf16 adjacency
    xp = x_ref[0]                                   # [n, 64]  bf16 = [x_in | 0]

    # ---- conv1: h1 = relu((A @ x) @ W1 + b1) --------------------------------
    aggx = jnp.dot(a, xp, preferred_element_type=f32)               # [n, 64]
    h1 = jnp.maximum(
        jnp.dot(aggx.astype(bf), w1_ref[...], preferred_element_type=f32)
        + b1_ref[...], 0.0)                                         # [n, 64]

    # ---- lane-dense aggregate slab  A @ [h1 | x_in | 0]  (reused by conv2&3) -
    aggh1 = jnp.dot(a, h1.astype(bf), preferred_element_type=f32)   # [n, 64]
    agg_ref[:, 0:64] = aggh1
    agg_ref[:, 64:128] = aggx
    agg1 = agg_ref[...].astype(bf)                                  # [n, 128]

    # ---- conv2: h2 = relu((A @ cat1) @ W2 + b2) -----------------------------
    h2 = jnp.maximum(
        jnp.dot(agg1, w2_ref[...], preferred_element_type=f32) + b2_ref[...],
        0.0)                                                        # [n, 128]

    # ---- conv3 (x_in group deduplicated into w3a row-slices) ----------------
    aggh2 = jnp.dot(a, h2.astype(bf), preferred_element_type=f32)   # [n, 128]
    h3 = jnp.maximum(
        jnp.dot(agg1, w3a_ref[...], preferred_element_type=f32)
        + jnp.dot(aggh2.astype(bf), w3b_ref[...], preferred_element_type=f32)
        + b3_ref[...], 0.0)                                         # [n, 256]

    # ---- global max pool + critical points ----------------------------------
    # TODO(synk): the custom global_max_pool's tie-break convention is unknown;
    #             we return the FIRST node index achieving the per-channel max.
    mx = jnp.max(h3, axis=0, keepdims=True)                         # [1, 256]
    rows = jax.lax.broadcasted_iota(jnp.int32, h3.shape, 0)
    first = jnp.min(jnp.where(h3 == mx, rows, n_per_batch),
                    axis=0, keepdims=True)                          # [1, 256]
    crit_ref[0] = first + pl.program_id(0) * n_per_batch

    # ---- lin1 + log_softmax + softmax ---------------------------------------
    logits = jnp.dot(mx, wl_ref[...], preferred_element_type=f32) + bl_ref[...]
    z = logits - jnp.max(logits, axis=-1, keepdims=True)
    logp = z - jnp.log(jnp.sum(jnp.exp(z), axis=-1, keepdims=True))
    logp_ref[0] = logp
    pred_ref[0] = jnp.exp(logp)


# ----------------------------------------------------------------------------
# Weight folding (plain JAX, done once): fold the concats + x_in dedup into
# zero-padded, lane-dense weight row-slices matching the kernel's 128-wide
# aggregate slab layout [h1(64) | x_in(6) | zeros(58)].
# ----------------------------------------------------------------------------
def _fold_params(params, cin):
    f32, bf = jnp.float32, jnp.bfloat16
    w1, b1 = params["conv1"]                        # [6, 64],    [64]
    w2, b2 = params["conv2"]                        # [70, 128],  [128]
    w3, b3 = params["conv3"]                        # [204, 256], [256]
    wl, bl = params["lin1"]                         # [256, ncls],[ncls]
    c1, c2 = w1.shape[1], w2.shape[1]               # 64, 128

    # conv1 input = [x_in | 0] (64 wide)
    w1p = jnp.zeros((64, c1), f32).at[:cin].set(w1)
    # conv2 input cat1 = [h1 | x_in]; slab layout [h1(64) | x_in(cin) | 0]
    w2p = (jnp.zeros((128, c2), f32)
           .at[0:c1].set(w2[0:c1])
           .at[64:64 + cin].set(w2[c1:c1 + cin]))
    # conv3 input cat2 = [h1 | x_in | h2 | x_in]; x_in appears twice ->
    # pre-sum its two weight row-slices (exact dedup of A@x_in).
    w3a = (jnp.zeros((128, w3.shape[1]), f32)
           .at[0:c1].set(w3[0:c1])
           .at[64:64 + cin].set(w3[c1:c1 + cin] + w3[c1 + cin + c2:]))
    w3b = w3[c1 + cin:c1 + cin + c2]                # h2 rows -> [128, 256]

    return (w1p.astype(bf), w2p.astype(bf), w3a.astype(bf), w3b.astype(bf),
            b1.astype(f32).reshape(1, -1), b2.astype(f32).reshape(1, -1),
            b3.astype(f32).reshape(1, -1),
            wl.astype(f32), bl.astype(f32).reshape(1, -1))


# ----------------------------------------------------------------------------
# Forward pass wrapper
# ----------------------------------------------------------------------------
def gcncat_forward(params, norm, pos, edge_index, num_batches, n_per_batch):
    f32, bf = jnp.float32, jnp.bfloat16
    x_in = jnp.concatenate([norm, pos], axis=1).astype(f32)         # [N, 6]
    n_total, cin = x_in.shape
    assert n_total == num_batches * n_per_batch and cin <= 64
    c3 = params["conv3"][0].shape[1]
    ncls = params["lin1"][0].shape[1]

    # Per-graph dense adjacency blocks: A[g, dst, src] += 1 (edge_weight := 1).
    # TODO(synk): edge-list -> dense scatter-add kept in plain JAX; assumes
    #             batched graphs have no cross-graph edges (standard PyG batch).
    src, dst = edge_index[0], edge_index[1]
    g = dst // n_per_batch
    a3 = jnp.zeros((num_batches, n_per_batch, n_per_batch), f32)
    a3 = a3.at[g, dst % n_per_batch, src % n_per_batch].add(1.0).astype(bf)

    # Lane-padded node features [x_in | 0] -> width 64 (bf16 MXU operand).
    xp = jnp.zeros((n_total, 64), f32).at[:, :cin].set(x_in)
    x3 = xp.reshape(num_batches, n_per_batch, 64).astype(bf)

    w1p, w2p, w3a, w3b, b1r, b2r, b3r, wl, blr = _fold_params(params, cin)

    kernel = functools.partial(_gcncat_fused_kernel, n_per_batch=n_per_batch)
    logp, pred, crit = pl.pallas_call(
        kernel,
        out_shape=(
            jax.ShapeDtypeStruct((num_batches, 1, ncls), jnp.float32),
            jax.ShapeDtypeStruct((num_batches, 1, ncls), jnp.float32),
            jax.ShapeDtypeStruct((num_batches, 1, c3), jnp.int32),
        ),
        grid=(num_batches,),
        in_specs=[
            pl.BlockSpec((1, n_per_batch, n_per_batch), lambda i: (i, 0, 0)),
            pl.BlockSpec((1, n_per_batch, 64), lambda i: (i, 0, 0)),
            pl.BlockSpec((64, 64), lambda i: (0, 0)),        # w1 (padded)
            pl.BlockSpec((1, 64), lambda i: (0, 0)),          # b1
            pl.BlockSpec((128, 128), lambda i: (0, 0)),       # w2 (padded)
            pl.BlockSpec((1, 128), lambda i: (0, 0)),         # b2
            pl.BlockSpec((128, c3), lambda i: (0, 0)),        # w3a (cat1 + dedup x)
            pl.BlockSpec((128, c3), lambda i: (0, 0)),        # w3b (h2 rows)
            pl.BlockSpec((1, c3), lambda i: (0, 0)),          # b3
            pl.BlockSpec((c3, ncls), lambda i: (0, 0)),       # lin1 W
            pl.BlockSpec((1, ncls), lambda i: (0, 0)),        # lin1 b
        ],
        out_specs=(
            pl.BlockSpec((1, 1, ncls), lambda i: (i, 0, 0)),
            pl.BlockSpec((1, 1, ncls), lambda i: (i, 0, 0)),
            pl.BlockSpec((1, 1, c3), lambda i: (i, 0, 0)),
        ),
        scratch_shapes=[pltpu.VMEM((n_per_batch, 128), jnp.float32)],
        compiler_params=pltpu.CompilerParams(
            dimension_semantics=("parallel",),
            # Actual per-step footprint ~1 MiB; 32 MiB fits the scoped budget
            # on all generations and leaves headroom on v7x's 64 MiB VMEM.
            vmem_limit_bytes=32 * 1024 * 1024,
        ),
    )(a3, x3, w1p, b1r, w2p, b2r, w3a, w3b, b3r, wl, blr)
    return logp[:, 0], pred[:, 0], crit[:, 0]


# ----------------------------------------------------------------------------
# Plain-JAX reference (unfolded weights, explicit concats, same bf16 cast
# points and (A@X)@W association) used to validate the kernel's weight folding.
# ----------------------------------------------------------------------------
def matched_reference(params, norm, pos, edge_index, num_batches, n_per_batch):
    f32, bf = jnp.float32, jnp.bfloat16
    x_in = jnp.concatenate([norm, pos], axis=1).astype(f32)
    n = x_in.shape[0]
    a = jnp.zeros((n, n), f32).at[edge_index[1], edge_index[0]].add(1.0).astype(bf)

    w1, b1 = params["conv1"]; w2, b2 = params["conv2"]
    w3, b3 = params["conv3"]; wl, bl = params["lin1"]
    dot = lambda x, y: jnp.dot(x.astype(bf), y.astype(bf),
                               preferred_element_type=f32)

    aggx = dot(a, x_in)                                             # A @ x_in
    h1 = jax.nn.relu(dot(aggx, w1) + b1)                            # conv1
    aggh1 = dot(a, h1)
    agg_cat1 = jnp.concatenate([aggh1, aggx], axis=1)               # A @ cat1
    h2 = jax.nn.relu(dot(agg_cat1, w2) + b2)                        # conv2
    aggh2 = dot(a, h2)
    agg_cat2 = jnp.concatenate([agg_cat1, aggh2, aggx], axis=1)     # A @ cat2
    h3 = jax.nn.relu(dot(agg_cat2, w3) + b3)                        # conv3

    h3g = h3.reshape(num_batches, n_per_batch, -1)
    mx = jnp.max(h3g, axis=1)
    crit = (jnp.argmax(h3g, axis=1).astype(jnp.int32)
            + (jnp.arange(num_batches, dtype=jnp.int32) * n_per_batch)[:, None])
    logits = jnp.dot(mx, wl) + bl
    logp = jax.nn.log_softmax(logits, axis=-1)
    return logp, jnp.exp(logp), crit


# ----------------------------------------------------------------------------
# Graph construction helpers (plain JAX, data-dependent)
# ----------------------------------------------------------------------------
def knn_graph(pos, batch, k):
    # TODO(synk): kNN graph build is a data-dependent sort/gather; plain JAX.
    n = pos.shape[0]
    d2 = jnp.sum((pos[:, None, :] - pos[None, :, :]) ** 2, axis=-1)
    invalid = (batch[:, None] != batch[None, :]) | jnp.eye(n, dtype=bool)
    d2 = jnp.where(invalid, jnp.inf, d2)
    nbr = jnp.argsort(d2, axis=1)[:, :k].astype(jnp.int32)          # sources
    dst = jnp.repeat(jnp.arange(n, dtype=jnp.int32), k)
    src = nbr.reshape(-1)
    return jnp.stack([src, dst], axis=0)                            # [2, E]


def init_linear(key, cin, cout):
    kw, kb = jax.random.split(key)
    bound = 1.0 / math.sqrt(cin)
    w = jax.random.uniform(kw, (cin, cout), jnp.float32, -bound, bound)
    b = jax.random.uniform(kb, (cout,), jnp.float32, -bound, bound)
    return w, b


# ----------------------------------------------------------------------------
if __name__ == "__main__":
    NUM_CLASSES = 10
    NUM_BATCHES = 2
    N_PER_BATCH = 64
    N = NUM_BATCHES * N_PER_BATCH
    K_NEIGHBORS = 8

    root = jax.random.PRNGKey(0)
    kp, kn, k1, k2, k3, kl = jax.random.split(root, 6)

    pos = jax.random.uniform(kp, (N, 3), jnp.float32)
    nrm = jax.random.normal(kn, (N, 3), jnp.float32)
    nrm = nrm / jnp.linalg.norm(nrm, axis=-1, keepdims=True)
    batch = jnp.repeat(jnp.arange(NUM_BATCHES, dtype=jnp.int32), N_PER_BATCH)
    edge_index = knn_graph(pos, batch, K_NEIGHBORS)                 # [2, N*K]

    params = {
        "conv1": init_linear(k1, 6, 64),
        "conv2": init_linear(k2, 64 + 6, 128),
        "conv3": init_linear(k3, 192 + 12, 256),
        "lin1": init_linear(kl, 256, NUM_CLASSES),
    }

    out, pred, crit = gcncat_forward(params, nrm, pos, edge_index,
                                     NUM_BATCHES, N_PER_BATCH)
    out, pred, crit = jax.block_until_ready((out, pred, crit))

    # Structural checks
    assert out.shape == (NUM_BATCHES, NUM_CLASSES)
    assert pred.shape == (NUM_BATCHES, NUM_CLASSES)
    assert crit.shape == (NUM_BATCHES, 256)
    assert bool(jnp.all(jnp.isfinite(out))) and bool(jnp.all(jnp.isfinite(pred)))
    assert bool(jnp.allclose(jnp.sum(jnp.exp(out), axis=-1), 1.0, atol=1e-4))
    assert bool(jnp.allclose(jnp.sum(pred, axis=-1), 1.0, atol=1e-4))
    assert bool(jnp.allclose(pred, jnp.exp(out), atol=1e-6))
    lo = (jnp.arange(NUM_BATCHES, dtype=jnp.int32) * N_PER_BATCH)[:, None]
    assert bool(jnp.all((crit >= lo) & (crit < lo + N_PER_BATCH)))

    # Agreement with the plain-JAX (unfolded-weights, explicit-concat) reference
    ref_out, ref_pred, ref_crit = matched_reference(
        params, nrm, pos, edge_index, NUM_BATCHES, N_PER_BATCH)
    assert bool(jnp.allclose(out, ref_out, atol=5e-2))
    assert bool(jnp.allclose(pred, ref_pred, atol=2e-2))
    assert float(jnp.mean((crit == ref_crit).astype(jnp.float32))) > 0.9

    print("KERNEL_OK")
</pallas_src>

<mosaic_0001>
module attributes {stable_mosaic.version = 11 : i64} {
  func.func @_gcncat_fused_kernel(%arg0: i32, %arg1: memref<1x64x64xbf16, #tpu.memory_space<vmem>>, %arg2: memref<1x64x64xbf16, #tpu.memory_space<vmem>>, %arg3: memref<64x64xbf16, #tpu.memory_space<vmem>>, %arg4: memref<1x64xf32, #tpu.memory_space<vmem>>, %arg5: memref<128x128xbf16, #tpu.memory_space<vmem>>, %arg6: memref<1x128xf32, #tpu.memory_space<vmem>>, %arg7: memref<128x256xbf16, #tpu.memory_space<vmem>>, %arg8: memref<128x256xbf16, #tpu.memory_space<vmem>>, %arg9: memref<1x256xf32, #tpu.memory_space<vmem>>, %arg10: memref<256x10xf32, #tpu.memory_space<vmem>>, %arg11: memref<1x10xf32, #tpu.memory_space<vmem>>, %arg12: memref<1x1x10xf32, #tpu.memory_space<vmem>>, %arg13: memref<1x1x10xf32, #tpu.memory_space<vmem>>, %arg14: memref<1x1x256xi32, #tpu.memory_space<vmem>>, %arg15: memref<64x128xf32, #tpu.memory_space<vmem>>) attributes {dimension_semantics = [#tpu.dimension_semantics<parallel>], iteration_bounds = array<i64: 2>, scalar_prefetch = 0 : i64, scratch_operands = 1 : i64, tpu.core_type = #tpu.core_type<tc>, window_params = [{transform_indices = @transform_0, window_bounds = array<i64: 1, 64, 64>}, {transform_indices = @transform_1, window_bounds = array<i64: 1, 64, 64>}, {pipeline_mode = #tpu.pipeline_mode<synchronous>, transform_indices = @transform_2, window_bounds = array<i64: 64, 64>}, {pipeline_mode = #tpu.pipeline_mode<synchronous>, transform_indices = @transform_3, window_bounds = array<i64: 1, 64>}, {pipeline_mode = #tpu.pipeline_mode<synchronous>, transform_indices = @transform_4, window_bounds = array<i64: 128, 128>}, {pipeline_mode = #tpu.pipeline_mode<synchronous>, transform_indices = @transform_5, window_bounds = array<i64: 1, 128>}, {pipeline_mode = #tpu.pipeline_mode<synchronous>, transform_indices = @transform_6, window_bounds = array<i64: 128, 256>}, {pipeline_mode = #tpu.pipeline_mode<synchronous>, transform_indices = @transform_7, window_bounds = array<i64: 128, 256>}, {pipeline_mode = #tpu.pipeline_mode<synchronous>, transform_indices = @transform_8, window_bounds = array<i64: 1, 256>}, {pipeline_mode = #tpu.pipeline_mode<synchronous>, transform_indices = @transform_9, window_bounds = array<i64: 256, 10>}, {pipeline_mode = #tpu.pipeline_mode<synchronous>, transform_indices = @transform_10, window_bounds = array<i64: 1, 10>}, {transform_indices = @transform_11, window_bounds = array<i64: 1, 1, 10>}, {transform_indices = @transform_12, window_bounds = array<i64: 1, 1, 10>}, {transform_indices = @transform_13, window_bounds = array<i64: 1, 1, 256>}]} {
    %c0 = arith.constant 0 : index
    %c0_0 = arith.constant 0 : index
    %c0_1 = arith.constant 0 : index
    %0 = vector.load %arg1[%c0, %c0_0, %c0_1] : memref<1x64x64xbf16, #tpu.memory_space<vmem>>, vector<1x64x64xbf16>
    %1 = vector.shape_cast %0 : vector<1x64x64xbf16> to vector<64x64xbf16>
    %c0_2 = arith.constant 0 : index
    %c0_3 = arith.constant 0 : index
    %c0_4 = arith.constant 0 : index
    %2 = vector.load %arg2[%c0_2, %c0_3, %c0_4] : memref<1x64x64xbf16, #tpu.memory_space<vmem>>, vector<1x64x64xbf16>
    %3 = vector.shape_cast %2 : vector<1x64x64xbf16> to vector<64x64xbf16>
    %cst = arith.constant dense<0.000000e+00> : vector<64x64xf32>
    %4 = tpu.matmul %1, %3, %cst {dimension_numbers = #tpu.dot_dimension_numbers<[1], [0], [0], [1], [0, 0, 1, 1], [], []>} : vector<64x64xbf16>, vector<64x64xbf16>, vector<64x64xf32> -> vector<64x64xf32>
    %5 = arith.truncf %4 : vector<64x64xf32> to vector<64x64xbf16>
    %c0_5 = arith.constant 0 : index
    %c0_6 = arith.constant 0 : index
    %6 = vector.load %arg3[%c0_5, %c0_6] : memref<64x64xbf16, #tpu.memory_space<vmem>>, vector<64x64xbf16>
    %cst_7 = arith.constant dense<0.000000e+00> : vector<64x64xf32>
    %7 = tpu.matmul %5, %6, %cst_7 {dimension_numbers = #tpu.dot_dimension_numbers<[1], [0], [0], [1], [0, 0, 1, 1], [], []>} : vector<64x64xbf16>, vector<64x64xbf16>, vector<64x64xf32> -> vector<64x64xf32>
    %c0_8 = arith.constant 0 : index
    %c0_9 = arith.constant 0 : index
    %8 = vector.load %arg4[%c0_8, %c0_9] : memref<1x64xf32, #tpu.memory_space<vmem>>, vector<1x64xf32>
    %9 = vector.broadcast %8 : vector<1x64xf32> to vector<64x64xf32>
    %10 = arith.addf %7, %9 : vector<64x64xf32>
    %cst_10 = arith.constant 0.000000e+00 : f32
    %11 = vector.broadcast %cst_10 : f32 to vector<64x64xf32>
    %12 = arith.maximumf %10, %11 : vector<64x64xf32>
    %13 = arith.truncf %12 : vector<64x64xf32> to vector<64x64xbf16>
    %cst_11 = arith.constant dense<0.000000e+00> : vector<64x64xf32>
    %14 = tpu.matmul %1, %13, %cst_11 {dimension_numbers = #tpu.dot_dimension_numbers<[1], [0], [0], [1], [0, 0, 1, 1], [], []>} : vector<64x64xbf16>, vector<64x64xbf16>, vector<64x64xf32> -> vector<64x64xf32>
    %c0_12 = arith.constant 0 : index
    %c0_13 = arith.constant 0 : index
    %15 = vector.load %arg15[%c0_12, %c0_13] : memref<64x128xf32, #tpu.memory_space<vmem>>, vector<64x64xf32>
    tpu.vector_store %arg15[%c0_12, %c0_13], %14 {strides = array<i32>} : memref<64x128xf32, #tpu.memory_space<vmem>>, vector<64x64xf32>,
    %c0_14 = arith.constant 0 : index
    %c64 = arith.constant 64 : index
    %16 = vector.load %arg15[%c0_14, %c64] : memref<64x128xf32, #tpu.memory_space<vmem>>, vector<64x64xf32>
    tpu.vector_store %arg15[%c0_14, %c64], %4 {strides = array<i32>} : memref<64x128xf32, #tpu.memory_space<vmem>>, vector<64x64xf32>,
    %c0_15 = arith.constant 0 : index
    %c0_16 = arith.constant 0 : index
    %17 = vector.load %arg15[%c0_15, %c0_16] : memref<64x128xf32, #tpu.memory_space<vmem>>, vector<64x128xf32>
    %18 = arith.truncf %17 : vector<64x128xf32> to vector<64x128xbf16>
    %c0_17 = arith.constant 0 : index
    %c0_18 = arith.constant 0 : index
    %19 = vector.load %arg5[%c0_17, %c0_18] : memref<128x128xbf16, #tpu.memory_space<vmem>>, vector<128x128xbf16>
    %cst_19 = arith.constant dense<0.000000e+00> : vector<64x128xf32>
    %20 = tpu.matmul %18, %19, %cst_19 {dimension_numbers = #tpu.dot_dimension_numbers<[1], [0], [0], [1], [0, 0, 1, 1], [], []>} : vector<64x128xbf16>, vector<128x128xbf16>, vector<64x128xf32> -> vector<64x128xf32>
    %c0_20 = arith.constant 0 : index
    %c0_21 = arith.constant 0 : index
    %21 = vector.load %arg6[%c0_20, %c0_21] : memref<1x128xf32, #tpu.memory_space<vmem>>, vector<1x128xf32>
    %22 = vector.broadcast %21 : vector<1x128xf32> to vector<64x128xf32>
    %23 = arith.addf %20, %22 : vector<64x128xf32>
    %cst_22 = arith.constant 0.000000e+00 : f32
    %24 = vector.broadcast %cst_22 : f32 to vector<64x128xf32>
    %25 = arith.maximumf %23, %24 : vector<64x128xf32>
    %26 = arith.truncf %25 : vector<64x128xf32> to vector<64x128xbf16>
    %cst_23 = arith.constant dense<0.000000e+00> : vector<64x128xf32>
    %27 = tpu.matmul %1, %26, %cst_23 {dimension_numbers = #tpu.dot_dimension_numbers<[1], [0], [0], [1], [0, 0, 1, 1], [], []>} : vector<64x64xbf16>, vector<64x128xbf16>, vector<64x128xf32> -> vector<64x128xf32>
    %c0_24 = arith.constant 0 : index
    %c0_25 = arith.constant 0 : index
    %28 = vector.load %arg7[%c0_24, %c0_25] : memref<128x256xbf16, #tpu.memory_space<vmem>>, vector<128x256xbf16>
    %cst_26 = arith.constant dense<0.000000e+00> : vector<64x256xf32>
    %29 = tpu.matmul %18, %28, %cst_26 {dimension_numbers = #tpu.dot_dimension_numbers<[1], [0], [0], [1], [0, 0, 1, 1], [], []>} : vector<64x128xbf16>, vector<128x256xbf16>, vector<64x256xf32> -> vector<64x256xf32>
    %30 = arith.truncf %27 : vector<64x128xf32> to vector<64x128xbf16>
    %c0_27 = arith.constant 0 : index
    %c0_28 = arith.constant 0 : index
    %31 = vector.load %arg8[%c0_27, %c0_28] : memref<128x256xbf16, #tpu.memory_space<vmem>>, vector<128x256xbf16>
    %cst_29 = arith.constant dense<0.000000e+00> : vector<64x256xf32>
    %32 = tpu.matmul %30, %31, %cst_29 {dimension_numbers = #tpu.dot_dimension_numbers<[1], [0], [0], [1], [0, 0, 1, 1], [], []>} : vector<64x128xbf16>, vector<128x256xbf16>, vector<64x256xf32> -> vector<64x256xf32>
    %33 = arith.addf %29, %32 : vector<64x256xf32>
    %c0_30 = arith.constant 0 : index
    %c0_31 = arith.constant 0 : index
    %34 = vector.load %arg9[%c0_30, %c0_31] : memref<1x256xf32, #tpu.memory_space<vmem>>, vector<1x256xf32>
    %35 = vector.broadcast %34 : vector<1x256xf32> to vector<64x256xf32>
    %36 = arith.addf %33, %35 : vector<64x256xf32>
    %cst_32 = arith.constant 0.000000e+00 : f32
    %37 = vector.broadcast %cst_32 : f32 to vector<64x256xf32>
    %38 = arith.maximumf %36, %37 : vector<64x256xf32>
    %cst_33 = arith.constant dense<0xFF800000> : vector<256xf32>
    %39 = vector.multi_reduction <maximumf>, %38, %cst_33 [0] : vector<64x256xf32> to vector<256xf32>
    %40 = vector.shape_cast %39 : vector<256xf32> to vector<1x256xf32>
    %41 = tpu.iota {dimensions = array<i32: 0>} : vector<64x256xi32>
    %42 = vector.broadcast %40 : vector<1x256xf32> to vector<64x256xf32>
    %43 = arith.cmpf oeq, %38, %42 : vector<64x256xf32>
    %c64_i32 = arith.constant 64 : i32
    %44 = vector.broadcast %c64_i32 : i32 to vector<64x256xi32>
    %45 = arith.select %43, %41, %44 : vector<64x256xi1>, vector<64x256xi32>
    %cst_34 = arith.constant dense<2147483647> : vector<256xi32>
    %46 = vector.multi_reduction <minsi>, %45, %cst_34 [0] : vector<64x256xi32> to vector<256xi32>
    %47 = vector.shape_cast %46 : vector<256xi32> to vector<1x256xi32>
    %c64_i32_35 = arith.constant 64 : i32
    %48 = arith.muli %arg0, %c64_i32_35 : i32
    %49 = vector.broadcast %48 : i32 to vector<1x256xi32>
    %50 = arith.addi %47, %49 : vector<1x256xi32>
    %c0_36 = arith.constant 0 : index
    %c0_37 = arith.constant 0 : index
    %c0_38 = arith.constant 0 : index
    %51 = vector.load %arg14[%c0_36, %c0_37, %c0_38] : memref<1x1x256xi32, #tpu.memory_space<vmem>>, vector<1x1x256xi32>
    %52 = vector.shape_cast %51 : vector<1x1x256xi32> to vector<1x256xi32>
    %53 = vector.shape_cast %50 : vector<1x256xi32> to vector<1x1x256xi32>
    tpu.vector_store %arg14[%c0_36, %c0_37, %c0_38], %53 {strides = array<i32>} : memref<1x1x256xi32, #tpu.memory_space<vmem>>, vector<1x1x256xi32>,
    %c0_39 = arith.constant 0 : index
    %c0_40 = arith.constant 0 : index
    %54 = vector.load %arg10[%c0_39, %c0_40] : memref<256x10xf32, #tpu.memory_space<vmem>>, vector<256x10xf32>
    %cst_41 = arith.constant dense<0.000000e+00> : vector<1x10xf32>
    %55 = tpu.matmul %40, %54, %cst_41 {dimension_numbers = #tpu.dot_dimension_numbers<[1], [0], [0], [1], [0, 0, 1, 1], [], []>} : vector<1x256xf32>, vector<256x10xf32>, vector<1x10xf32> -> vector<1x10xf32>
    %c0_42 = arith.constant 0 : index
    %c0_43 = arith.constant 0 : index
    %56 = vector.load %arg11[%c0_42, %c0_43] : memref<1x10xf32, #tpu.memory_space<vmem>>, vector<1x10xf32>
    %57 = arith.addf %55, %56 : vector<1x10xf32>
    %cst_44 = arith.constant dense<0xFF800000> : vector<1xf32>
    %58 = vector.multi_reduction <maximumf>, %57, %cst_44 [1] : vector<1x10xf32> to vector<1xf32>
    %59 = vector.shape_cast %58 : vector<1xf32> to vector<1x1xf32>
    %60 = vector.broadcast %59 : vector<1x1xf32> to vector<1x10xf32>
    %61 = arith.subf %57, %60 : vector<1x10xf32>
    %62 = math.exp %61 : vector<1x10xf32>
    %cst_45 = arith.constant dense<0.000000e+00> : vector<1xf32>
    %63 = vector.multi_reduction <add>, %62, %cst_45 [1] : vector<1x10xf32> to vector<1xf32>
    %64 = vector.shape_cast %63 : vector<1xf32> to vector<1x1xf32>
    %65 = math.log %64 : vector<1x1xf32>
    %66 = vector.broadcast %65 : vector<1x1xf32> to vector<1x10xf32>
    %67 = arith.subf %61, %66 : vector<1x10xf32>
    %c0_46 = arith.constant 0 : index
    %c0_47 = arith.constant 0 : index
    %c0_48 = arith.constant 0 : index
    %68 = vector.load %arg12[%c0_46, %c0_47, %c0_48] : memref<1x1x10xf32, #tpu.memory_space<vmem>>, vector<1x1x10xf32>
    %69 = vector.shape_cast %68 : vector<1x1x10xf32> to vector<1x10xf32>
    %70 = vector.shape_cast %67 : vector<1x10xf32> to vector<1x1x10xf32>
    tpu.vector_store %arg12[%c0_46, %c0_47, %c0_48], %70 {strides = array<i32>} : memref<1x1x10xf32, #tpu.memory_space<vmem>>, vector<1x1x10xf32>,
    %71 = math.exp %67 : vector<1x10xf32>
    %c0_49 = arith.constant 0 : index
    %c0_50 = arith.constant 0 : index
    %c0_51 = arith.constant 0 : index
    %72 = vector.load %arg13[%c0_49, %c0_50, %c0_51] : memref<1x1x10xf32, #tpu.memory_space<vmem>>, vector<1x1x10xf32>
    %73 = vector.shape_cast %72 : vector<1x1x10xf32> to vector<1x10xf32>
    %74 = vector.shape_cast %71 : vector<1x10xf32> to vector<1x1x10xf32>
    tpu.vector_store %arg13[%c0_49, %c0_50, %c0_51], %74 {strides = array<i32>} : memref<1x1x10xf32, #tpu.memory_space<vmem>>, vector<1x1x10xf32>,
    return
  }
  func.func @transform_0(%arg0: i32) -> (i32, i32, i32) {
    %c0_i32 = arith.constant 0 : i32
    %c0_i32_0 = arith.constant 0 : i32
    %c0_i32_1 = arith.constant 0 : i32
    return %arg0, %c0_i32, %c0_i32_0 : i32, i32, i32
  }
  func.func @transform_1(%arg0: i32) -> (i32, i32, i32) {
    %c0_i32 = arith.constant 0 : i32
    %c0_i32_0 = arith.constant 0 : i32
    %c0_i32_1 = arith.constant 0 : i32
    return %arg0, %c0_i32, %c0_i32_0 : i32, i32, i32
  }
  func.func @transform_2(%arg0: i32) -> (i32, i32) {
    %c0_i32 = arith.constant 0 : i32
    %c0_i32_0 = arith.constant 0 : i32
    %c0_i32_1 = arith.constant 0 : i32
    return %c0_i32, %c0_i32_0 : i32, i32
  }
  func.func @transform_3(%arg0: i32) -> (i32, i32) {
    %c0_i32 = arith.constant 0 : i32
    %c0_i32_0 = arith.constant 0 : i32
    %c0_i32_1 = arith.constant 0 : i32
    return %c0_i32, %c0_i32_0 : i32, i32
  }
  func.func @transform_4(%arg0: i32) -> (i32, i32) {
    %c0_i32 = arith.constant 0 : i32
    %c0_i32_0 = arith.constant 0 : i32
    %c0_i32_1 = arith.constant 0 : i32
    return %c0_i32, %c0_i32_0 : i32, i32
  }
  func.func @transform_5(%arg0: i32) -> (i32, i32) {
    %c0_i32 = arith.constant 0 : i32
    %c0_i32_0 = arith.constant 0 : i32
    %c0_i32_1 = arith.constant 0 : i32
    return %c0_i32, %c0_i32_0 : i32, i32
  }
  func.func @transform_6(%arg0: i32) -> (i32, i32) {
    %c0_i32 = arith.constant 0 : i32
    %c0_i32_0 = arith.constant 0 : i32
    %c0_i32_1 = arith.constant 0 : i32
    return %c0_i32, %c0_i32_0 : i32, i32
  }
  func.func @transform_7(%arg0: i32) -> (i32, i32) {
    %c0_i32 = arith.constant 0 : i32
    %c0_i32_0 = arith.constant 0 : i32
    %c0_i32_1 = arith.constant 0 : i32
    return %c0_i32, %c0_i32_0 : i32, i32
  }
  func.func @transform_8(%arg0: i32) -> (i32, i32) {
    %c0_i32 = arith.constant 0 : i32
    %c0_i32_0 = arith.constant 0 : i32
    %c0_i32_1 = arith.constant 0 : i32
    return %c0_i32, %c0_i32_0 : i32, i32
  }
  func.func @transform_9(%arg0: i32) -> (i32, i32) {
    %c0_i32 = arith.constant 0 : i32
    %c0_i32_0 = arith.constant 0 : i32
    %c0_i32_1 = arith.constant 0 : i32
    return %c0_i32, %c0_i32_0 : i32, i32
  }
  func.func @transform_10(%arg0: i32) -> (i32, i32) {
    %c0_i32 = arith.constant 0 : i32
    %c0_i32_0 = arith.constant 0 : i32
    %c0_i32_1 = arith.constant 0 : i32
    return %c0_i32, %c0_i32_0 : i32, i32
  }
  func.func @transform_11(%arg0: i32) -> (i32, i32, i32) {
    %c0_i32 = arith.constant 0 : i32
    %c0_i32_0 = arith.constant 0 : i32
    %c0_i32_1 = arith.constant 0 : i32
    return %arg0, %c0_i32, %c0_i32_0 : i32, i32, i32
  }
  func.func @transform_12(%arg0: i32) -> (i32, i32, i32) {
    %c0_i32 = arith.constant 0 : i32
    %c0_i32_0 = arith.constant 0 : i32
    %c0_i32_1 = arith.constant 0 : i32
    return %arg0, %c0_i32, %c0_i32_0 : i32, i32, i32
  }
  func.func @transform_13(%arg0: i32) -> (i32, i32, i32) {
    %c0_i32 = arith.constant 0 : i32
    %c0_i32_0 = arith.constant 0 : i32
    %c0_i32_1 = arith.constant 0 : i32
    return %arg0, %c0_i32, %c0_i32_0 : i32, i32, i32
  }
}

</mosaic_0001>

<bundles_post_ra>
// kernel: tpu_custom_call.1
= control target key start
LH: loop header
LB: loop body
LE: loop exit
PB: predicated region body
PF: predicated region fallthrough
CT: control target
= control target key end

     0   :  { %s3236_s0 = inlined_call_operand.hbm [shape: bf16[2,64,64], index: 0, kind: input, shape index: {}]   ;;  %s3237_s1 = inlined_call_operand.hbm [shape: bf16[2,64,64], index: 1, kind: input, shape index: {}]   ;;  %s3238_s2 = inlined_call_operand.vmem [shape: bf16[64,64], index: 2, kind: input, shape index: {}]   ;;  %s3239_s3 = inlined_call_operand.hbm [shape: f32[1,64], index: 3, kind: input, shape index: {}]   ;;  %s3240_s4 = inlined_call_operand.hbm [shape: bf16[128,128], index: 4, kind: input, shape index: {}]   ;;  %s3241_s5 = inlined_call_operand.vmem [shape: f32[1,128], index: 5, kind: input, shape index: {}]   ;;  %s3242_s6 = inlined_call_operand.vmem [shape: bf16[128,256], index: 6, kind: input, shape index: {}]   ;;  %s3243_s7 = inlined_call_operand.vmem [shape: bf16[128,256], index: 7, kind: input, shape index: {}]   ;;  %s3244_s8 = inlined_call_operand.vmem [shape: f32[1,256], index: 8, kind: input, shape index: {}]   ;;  %s3245_s9 = inlined_call_operand.vmem [shape: f32[256,10], index: 9, kind: input, shape index: {}]   ;;  %s3246_s10 = inlined_call_operand.vmem [shape: f32[1,10], index: 10, kind: input, shape index: {}]   ;;  %s3247_s11 = inlined_call_operand.hbm [shape: f32[2,1,10], index: 11, kind: output, shape index: {0}]   ;;  %s3248_s12 = inlined_call_operand.hbm [shape: f32[2,1,10], index: 12, kind: output, shape index: {1}]   ;;  %s3249_s13 = inlined_call_operand.hbm [shape: s32[2,1,256], index: 13, kind: output, shape index: {2}]  }
   0x1   :  { %3262 = sst [smem:[#allocation27_spill]] %s3236_s0 }
   0x2   :  { %3263 = sst [smem:[#allocation28_spill]] %s3237_s1 }
   0x3   :  { %3264 = sst [smem:[#allocation29_spill]] %s3239_s3 }
   0x4   :  { %3265 = sst [smem:[#allocation30_spill]] %s3240_s4 }
   0x5   :  { %3266 = sst [smem:[#allocation31_spill]] %s3246_s10 }
   0x6   :  { %3267 = sst [smem:[#allocation32_spill]] %s3247_s11 }
   0x7   :  { %3268 = sst [smem:[#allocation33_spill]] %s3248_s12 }
   0x8   :  { %3269 = sst [smem:[#allocation34_spill]] %s3249_s13 }
   0x9   :  { %19 = vsyncpa [#allocation4], 0 }
   0xa   :  { %21 = vsyncpa [#allocation4 + $0x1], 0 }
   0xb   :  { %22 = vsyncpa [#allocation7], 0 }
   0xc   :  { %24 = vsyncpa [#allocation7 + $0x1], 0 }
   0xd   :  { %25 = vsyncpa [#allocation10], 0 }
   0xe   :  { %26 = vsyncpa [#allocation5], 0 }
   0xf   :  { %28 = vsyncpa [#allocation5 + $0x1], 0 }
  0x10   :  { %29 = vsyncpa [#allocation13], 0 }
  0x11   :  { %31 = vsyncpa [#allocation13 + $0x1], 0  ;;  %s2490_s25 = smov 0   ;;  %s2492_s26 = smov 0  }
  0x12   :  { %s2494_s27 = smov 0   ;;  %s2496_s28 = smov 0  }
  0x13 LB: > { %3270 = sst [smem:[#allocation21_spill]] %s2401_s25  ;;  %s2511_s29 = sadd.s32 4294967295, %s2413_s28   ;;  %s2413_s28 = sphi %s2496_s28, %s3297_s28   ;;  %s2409_s27 = sphi %s2494_s27, %s3299_s27   ;;  %s2405_s26 = sphi %s2492_s26, %s3301_s26   ;;  %s2401_s25 = sphi %s2490_s25, %s3300_s25  }
  0x14   : > { %3271 = sst [smem:[#allocation22_spill]] %s2409_s27  ;;  %s3250_s30 = sadd.s32 4294967294, %s2413_s28  }
  0x15   : > { %s2515_s14 = sadd.s32 1, %s2413_s28   ;;  %s44_s15 = sadd.s32 1, %s2409_s27 }
  0x16   : > { %3272 = sst [smem:[#allocation23_spill]] %s2515_s14  ;;  %s41_s16 = ssub.s32 %s2413_s28, %s2515_s14 }
  0x17   : > { %p51_p0 = scmp.ne.s32.totalorder %s2409_s27, %s2405_s26  ;;  %p42_p1 = scmp.eq.s32.totalorder %s41_s16, 0 }
  0x18   : > { %p52_p2 = scmp.eq.s32.totalorder %s2413_s28, 0  ;;  %p57_p3 = scmp.ne.s32.totalorder %s2405_s26, %s2401_s25 }
  0x19   : > { %p58_p4 = scmp.eq.s32.totalorder %s2511_s29, 0  ;;  %p296_p7 = scmp.eq.s32.totalorder %s2511_s29, 1 }
  0x1a   : > { %s2527_s17 = scalar_select %p42_p1, %s2409_s27, %s44_s15  }
  0x1b   : > { %p2529_p5 = por %p52_p2, %p51_p0  ;;  %p2535_p6 = por %p58_p4, %p57_p3 }
  0x1c   : > { %3273 = sst [smem:[#allocation24_spill]] %s2527_s17  ;;  %p302_p8 = scmp.eq.s32.totalorder %s3250_s30, 1 }
  0x1d   : > { %p1755_p9 = scmp.ge.s32.totalorder %s2413_s28, 1  ;;  %p361_p10 = scmp.lt.s32.totalorder %s2413_s28, 3 }
  0x1e   : > { %p2544_p11 = por %p296_p7, %p51_p0  ;;  %p2548_p12 = por %p302_p8, %p57_p3 }
  0x1f   : > { %p2552_p13 = pnand %p1755_p9, %p361_p10  ;;  %s3281_s3 = sld [smem:[#allocation29_spill]] }
  0x20   : > { %s3276_s20 = scalar_select %p2544_p11, 1, 0 }
  0x21   : > { %s3278_s21 = scalar_select %p2548_p12, 1, 0 }
  0x22   : > { %3277 = sst [smem:[#allocation25_spill]] %s3276_s20  ;;  %p2080_p1 = pneg %p2552_p13 }
  0x23   : > { %3279 = sst [smem:[#allocation26_spill]] %s3278_s21  ;;  %s2415_s16 = smov [#allocation8]  }
  0x24   : > { %s378_s30 = sshll.u32 %s2415_s16, 4  ;;  %p2081_p2 = pnand %p2080_p1, %p58_p4  ;;  %s379_s30 = int_to_ptr.vmem [resolvable:$true] %s378_s30 }
  0x25   : > { %s376_s15 = sshll.u32 %s3281_s3, 4  ;;  %p2106_p3 = scmp.lt.s32.totalorder %s2413_s28, 2  ;;  %s377_s15 = int_to_ptr.hbm [resolvable:$true] %s376_s15 }
  0x26   : > { %s3282_s4 = sld [smem:[#allocation30_spill]]  ;;  %s2416_s24 = smov [#allocation9]  }
  0x27   : > { %2083 = dma.hbm_to_vmem [thread:$0]  (!%p2081_p2), %s377_s15, 16, %s379_s30, [#allocation7]  }
  0x28   : > { %p2570_p7 = pnand %p2106_p3, %p2529_p5  ;;  %s389_s3 = sshll.u32 %s2416_s24, 4  ;;  %s390_s3 = int_to_ptr.vmem [resolvable:$true] %s389_s3 }
  0x29   : > { %s421_s16 = sand.u32 1, %s2409_s27   ;;  %s2417_s25 = smov 64  }
  0x2a   : > { %s2418_s13 = smov 4   ;;  %s1759_s14 = sshll.u32 %s421_s16, 5 }
  0x2b   : > { %s2000_s17 = sshll.u32 %s2413_s28, 5  ;;  %s3284_s0 = sld [smem:[#allocation27_spill]] }
  0x2c   : > { %s387_s21 = sshll.u32 %s3282_s4, 4  ;;  %s425_s4 = scalar_lea.vmem [#allocation3], %s1759_s14  ;;  %s388_s21 = int_to_ptr.hbm [resolvable:$true] %s387_s21 }
  0x2d   : > { %2086 = dma.hbm_to_vmem [thread:$0]  (!%p2081_p2), %s388_s21, 1024, %s390_s3, [#allocation10], %s2417_s25, %s2417_s25, %s2418_s13  }
  0x2e   : > { %s433_s12 = sshll.u32 %s425_s4, 4  ;;  %s422_s24 = scalar_lea.sflag [#allocation4], %s421_s16  ;;  %s434_s12 = int_to_ptr.vmem [resolvable:$true] %s433_s12 }
  0x2f   : > { %p2219_p8 = pneg %p2570_p7 }
  0x31   : > { %s430_s15 = scalar_lea.hbm %s3284_s0, %s2000_s17  ;;  %s2222_s30 = scalar_lea.hbm %s3284_s0, 64 }
  0x32   : > { %s431_s20 = sshll.u32 %s430_s15, 4  ;;  %s432_s20 = int_to_ptr.hbm [resolvable:$true] %s431_s20 }
  0x33   : > { %s2215_s27 = sshra.s32 %s432_s20, 4  ;;  %s2216_s27 = int_to_ptr.hbm [resolvable:$true] %s2215_s27 }
  0x34   : > { %s2217_s11 = scalar_lea.hbm %s2216_s27, 32  ;;  %p2223_p1 = scmp.lt.s32.totalorder %s2216_s27, %s3284_s0 }
  0x35   : > { %p2218_p5 = scmp.ne.s32.totalorder %s2216_s27, %s2217_s11  ;;  %p2224_p2 = scmp.lt.s32.totalorder %s2222_s30, %s2217_s11 }
  0x37   : > { %p2220_p9 = pnand %p2219_p8, %p2218_p5  ;;  %p2225_p3 = por %p2224_p2, %p2223_p1 }
  0x39   : > { %p2221_p10 = pneg %p2220_p9 }
  0x3b   : > { %p2226_p0 = pnand %p2225_p3, %p2221_p10 }
  0x3d   : > { %2229 = shalt.err (!%p2226_p0)
}
  0x3e   : > { %2090 = dma.hbm_to_vmem [thread:$0]  (!%p2570_p7), %s432_s20, 512, %s434_s12, %s422_s24, %s2417_s25, %s2417_s25, %s2418_s13  }
  0x3f   : > { %s3285_s1 = sld [smem:[#allocation28_spill]]  ;;  %s447_s21 = scalar_lea.vmem [#allocation6], %s1759_s14 }
  0x40   : > { %s455_s10 = sshll.u32 %s447_s21, 4  ;;  %s443_s11 = sand.u32 1, %s2413_s28   ;;  %s456_s10 = int_to_ptr.vmem [resolvable:$true] %s455_s10 }
  0x41   : > { %s444_s27 = scalar_lea.sflag [#allocation7], %s443_s11 }
  0x45   : > { %s452_s3 = scalar_lea.hbm %s3285_s1, %s2000_s17  ;;  %s2252_s24 = scalar_lea.hbm %s3285_s1, 64 }
  0x46   : > { %s453_s18 = sshll.u32 %s452_s3, 4  ;;  %s454_s18 = int_to_ptr.hbm [resolvable:$true] %s453_s18 }
  0x47   : > { %s2245_s30 = sshra.s32 %s454_s18, 4  ;;  %s2246_s30 = int_to_ptr.hbm [resolvable:$true] %s2245_s30 }
  0x48   : > { %s2247_s4 = scalar_lea.hbm %s2246_s30, 32  ;;  %p2253_p10 = scmp.lt.s32.totalorder %s2246_s30, %s3285_s1 }
  0x49   : > { %p2248_p0 = scmp.ne.s32.totalorder %s2246_s30, %s2247_s4  ;;  %p2254_p1 = scmp.lt.s32.totalorder %s2252_s24, %s2247_s4 }
  0x4b   : > { %p2250_p5 = pnand %p2248_p0, %p2219_p8  ;;  %p2255_p2 = por %p2254_p1, %p2253_p10 }
  0x4d   : > { %p2251_p9 = pneg %p2250_p5 }
  0x4f   : > { %p2256_p3 = pnand %p2255_p2, %p2251_p9 }
  0x51   : > { %2259 = shalt.err (!%p2256_p3)
}
  0x52   : > { %2093 = dma.hbm_to_vmem [thread:$0]  (!%p2570_p7), %s454_s18, 512, %s456_s10, %s444_s27, %s2417_s25, %s2417_s25, %s2418_s13  }
  0x53   : > { %467 = sbr.rel (%p2552_p13) target bundleno = 1583 (0x62f), region = 64  ;;  %s2619_s16 = sand.u32 (!%p2552_p13), 1, %s2405_s26  }
  0x54   : > { %s1766_s15 = sshll.u32 (!%p2552_p13), %s2619_s16, 5  ;;  %s470_s3 = scalar_lea.sflag (!%p2552_p13), [#allocation4], %s2619_s16 }
  0x55   : > { %s2623_s21 = scalar_lea.vmem (!%p2552_p13), [#allocation3], %s1766_s15 }
  0x58   : > { %2376 = dma.done.wait (%p2535_p6), %s470_s3, 512  }
  0x59   : > { %2378 = vsyncadd (%p2535_p6), %s470_s3, 4294966784  ;;  %s3261_s10 = sand.u32 1, %s2511_s29   ;;  %s483_s25 = scalar_lea.vmem [#allocation6], %s1766_s15 }
  0x5a   : > { %s480_s13 = scalar_lea.sflag [#allocation7], %s3261_s10 }
  0x5b   : > { %2380 = dma.done.wait (%p2535_p6), %s480_s13, 512  }
  0x5c   : > { %2382 = vsyncadd (%p2535_p6), %s480_s13, 4294966784 }
  0x5d   : > { %2384 = dma.done.wait (%p58_p4), [#allocation7], 16  }
  0x5e   : > { %2386 = vsyncadd (%p58_p4), [#allocation7], 4294967280 }
  0x5f   : > { %2388 = dma.done.wait (%p58_p4), [#allocation10], 1024  }
  0x60   : > { %2390 = vsyncadd (%p58_p4), [#allocation10], 4294966272  ;;  %v2009_v0 = vld [vmem:[%s483_s25 + $0x18] sm:$0xff]  ;;  %v2008_v1 = vld [vmem:[%s483_s25 + $0x10] sm:$0xff]  ;;  %vm611_vm0 = vcmask 523264   ;;  %s2419_s12 = smov 64  }
  0x61   : > { %628 = vmatpush.bf16.msra.mxu0 %v2009_v0  ;;  %2054 = vmatpush.bf16.msra.mxu1 %v2009_v0  ;;  %v2007_v2 = vld [vmem:[%s483_s25 + $0x8] sm:$0xff]  ;;  %v2006_v3 = vld [vmem:[%s483_s25] sm:$0xff]  ;;  %v2013_v4 = vld [vmem:[%s3238_s2 + $0x18] sm:$0xff]  ;;  %vm815_vm1 = vcmask 1048064   ;;  %s1995_s4 = sshll.u32 %s2511_s29, 6  ;;  %s3286_s14 = sld [smem:[#allocation31_spill]] }
  0x62   : > { %2055 = vmatpush.bf16.msra.mxu2 %v2009_v0  ;;  %v2648_v5 = vld [vmem:[%s2623_s21] sm:$0xff]  ;;  %v2651_v6 = vld [vmem:[%s2623_s21 + $0x10] sm:$0xff]  ;;  %v2654_v7 = vld [vmem:[%s2623_s21 + $0x18] sm:$0xff]  ;;  %s536_s25 = scalar_lea.vmem [#allocation11], %s2619_s16  ;;  %s1997_s18 = sshll.u32 %s2511_s29, 1 }
  0x63   : > { %v2663_v8 = vld [vmem:[%s2623_s21 + $0x8] sm:$0xff]  ;;  %v2012_v9 = vld [vmem:[%s3238_s2 + $0x10] sm:$0xff]  ;;  %v2010_v11 = vld [vmem:[%s3238_s2] sm:$0xff]  ;;  %s3287_s21 = sld [smem:[#allocation32_spill]]  ;;  %s1559_s22 = sshll.u32 %s536_s25, 4  ;;  %s1560_s22 = int_to_ptr.vmem [resolvable:$true] %s1559_s22 }
  0x64   : > { %v2011_v10 = vld [vmem:[%s3238_s2 + $0x8] sm:$0xff]  ;;  %v2147_v31 = vld [vmem:[#allocation8] ss:$0 sm:$0xff]  ;;  %v2020_v54 = vld [vmem:[#allocation9 + $0x30] sm:$0xff]  ;;  %s3289_s30 = sld [smem:[#allocation33_spill]] }
  0x65   : > { %629 = vmatpush.bf16.msra.mxu0 %v2008_v1  ;;  %2056 = vmatpush.bf16.msra.mxu1 %v2008_v1  ;;  %v2021_v53 = vld [vmem:[#allocation9 + $0x38] sm:$0xff]  ;;  %v2019_v55 = vld [vmem:[#allocation9 + $0x28] sm:$0xff]  ;;  %v2018_v56 = vld [vmem:[#allocation9 + $0x20] sm:$0xff] }
  0x66   : > { %2057 = vmatpush.bf16.msra.mxu2 %v2008_v1  ;;  %904 = vmatpush.bf16.msra.mxu3 %v2021_v53  ;;  %v2017_v57 = vld [vmem:[#allocation9 + $0x18] sm:$0xff]  ;;  %v2016_v58 = vld [vmem:[#allocation9 + $0x10] sm:$0xff]  ;;  %v2015_v59 = vld [vmem:[#allocation9 + $0x8] sm:$0xff] }
  0x67   : > { %v2014_v60 = vld [vmem:[#allocation9] sm:$0xff] }
  0x69   : > { %630 = vmatpush.bf16.msra.mxu0 %v2007_v2  ;;  %2058 = vmatpush.bf16.msra.mxu1 %v2007_v2  ;;  %s1557_s13 = scalar_lea.hbm %s3287_s21, %s2511_s29  ;;  %s2295_s3 = scalar_lea.hbm %s3287_s21, 2 }
  0x6a   : > { %2059 = vmatpush.bf16.msra.mxu2 %v2007_v2  ;;  %905 = vmatpush.bf16.msra.mxu3 %v2020_v54  ;;  %s1561_s23 = sshll.u32 %s1557_s13, 4  ;;  %s1562_s23 = int_to_ptr.hbm [resolvable:$true] %s1561_s23 }
  0x6b   : > { %s2289_s24 = sshra.s32 %s1562_s23, 4  ;;  %s2290_s24 = int_to_ptr.hbm [resolvable:$true] %s2289_s24 }
  0x6c   : > { %s2291_s17 = scalar_lea.hbm %s2290_s24, 1  ;;  %p2296_p7 = scmp.lt.s32.totalorder %s2290_s24, %s3287_s21 }
  0x6d   : > { %631 = vmatpush.bf16.msra.mxu0 %v2006_v3  ;;  %2060 = vmatpush.bf16.msra.mxu1 %v2006_v3  ;;  %p2292_p4 = scmp.ne.s32.totalorder %s2290_s24, %s2291_s17  ;;  %p2297_p8 = scmp.lt.s32.totalorder %s2295_s3, %s2291_s17 }
  0x6e   : > { %2061 = vmatpush.bf16.msra.mxu2 %v2006_v3  ;;  %906 = vmatpush.bf16.msra.mxu3 %v2019_v55 }
  0x6f   : > { %p2293_p6 = pnand %p2292_p4, %p2544_p11  ;;  %p2298_p0 = por %p2297_p8, %p2296_p7 }
  0x70   : > { %1803 = vmatmul.msk.bf16.vlgmr.msra.gmra.mxu0 %vm611_vm0, %v2648_v5  ;;  %1805 = vmatmul.msk.bf16.vlgmr.msra.gmra.mxu1 %vm611_vm0, %v2651_v6 }
  0x71   : > { %709 = vmatpush.bf16.msrb.mxu1 %v2013_v4  ;;  %1806 = vmatmul.msk.bf16.vlgmr.msra.gmra.mxu2 %vm611_vm0, %v2654_v7  ;;  %p2294_p13 = pneg %p2293_p6 }
  0x72   : > { %907 = vmatpush.bf16.msra.mxu3 %v2018_v56 }
  0x73   : > { %p2299_p5 = pnand %p2298_p0, %p2294_p13 }
  0x75   : > { %710 = vmatpush.bf16.msrb.mxu1 %v2012_v9 }
  0x76   : > { %908 = vmatpush.bf16.msra.mxu3 %v2017_v57 }
  0x79   : > { %711 = vmatpush.bf16.msrb.mxu1 %v2011_v10  ;;  %v1989_v10 = vld [vmem:[%s3242_s6 + $0x70] sm:$0xf] }
  0x7a   : > { %909 = vmatpush.bf16.msra.mxu3 %v2016_v58 }
  0x7d   : > { %712 = vmatpush.bf16.msrb.mxu1 %v2010_v11  ;;  %v2037_v11 = vld [vmem:[%s3242_s6 + $0x74] sm:$0xf0] }
  0x7e   : > { %910 = vmatpush.bf16.msra.mxu3 %v2015_v59 }
  0x80   : > { %1804 = vmatmul.msk.bf16.gmra.mxu0 %vm611_vm0, %v2663_v8 }
  0x82   : > { %911 = vmatpush.bf16.msra.mxu3 %v2014_v60  ;;  %v2148_v60 = vld [vmem:[%s3241_s5] ss:$0 sm:$0xff] }
  0xed   : > { %v633_v12 = vpop.f32.mrf.mxu0  ;;  %v643_v13 = vpop.f32.mrf.mxu1 }
  0xee   : > { %791 = vrot.lane.b32.xlu0 %v633_v12, %s2419_s12  ;;  %799 = vrot.lane.b32.xlu2 %v643_v13, %s2419_s12 }
  0xf4   : > { %v648_v18 = vpop.f32.mrf.mxu2 }
  0xf5   : > { %v635_v14 = vpop.f32.mrf.mxu0  ;;  %v645_v15 = vpop.f32.mrf.mxu1 }
  0xf6   : > { %v653_v16 = vpack.c.bf16 %v635_v14, %v633_v12  ;;  %793 = vrot.lane.b32.xlu0 %v635_v14, %s2419_s12  ;;  %801 = vrot.lane.b32.xlu2 %v645_v15, %s2419_s12  ;;  %v655_v22 = vpack.c.bf16 %v645_v15, %v643_v13  ;;  %v1990_v12 = vor.u32 %v2037_v11, %v1989_v10  ;;  %v1981_v13 = vld [vmem:[%s3242_s6 + $0x60] sm:$0xf]  ;;  %v2035_v14 = vld [vmem:[%s3242_s6 + $0x64] sm:$0xf0] }
  0xf7   : > { %v1982_v15 = vor.u32 %v2035_v14, %v1981_v13 }
  0xf8   : > { %1823 = vmatmul.msk.bf16.vlgmr.msrb.gmra.mxu1 %vm611_vm0, %v653_v16  ;;  %1228 = vmatpush.bf16.msrb.mxu3 %v1990_v12 }
  0xfc   : > { %v650_v21 = vpop.f32.mrf.mxu2  ;;  %1229 = vmatpush.bf16.msrb.mxu3 %v1982_v15 }
  0xfd   : > { %v638_v17 = vpop.f32.mrf.mxu0  ;;  %v656_v23 = vpack.c.bf16 %v650_v21, %v648_v18 }
  0xfe   : > { %795 = vrot.lane.b32.xlu1 %v638_v17, %s2419_s12  ;;  %803 = vrot.lane.b32.xlu0 %v648_v18, %s2419_s12  ;;  %v1973_v18 = vld [vmem:[%s3242_s6 + $0x50] sm:$0xf] }
 0x105   : > { %v640_v19 = vpop.f32.mrf.mxu0 }
 0x106   : > { %v654_v20 = vpack.c.bf16 %v640_v19, %v638_v17  ;;  %797 = vrot.lane.b32.xlu1 %v640_v19, %s2419_s12  ;;  %v2033_v19 = vld [vmem:[%s3242_s6 + $0x54] sm:$0xf0] }
 0x108   : > { %1824 = vmatmul.msk.bf16.gmra.mxu1 %vm611_vm0, %v654_v20  ;;  %v1974_v20 = vor.u32 %v2033_v19, %v1973_v18 }
 0x10a   : > { %1230 = vmatpush.bf16.msrb.mxu3 %v1974_v20 }
 0x10e   : > { %805 = vrot.lane.b32.xlu1 %v650_v21, %s2419_s12  ;;  %v1965_v21 = vld [vmem:[%s3242_s6 + $0x40] sm:$0xf]  ;;  %s1770_s12 = sshll.u32 %s2619_s16, 1 }
 0x10f   : > { %s3151_s20 = scalar_lea.vmem [#allocation14], %s1770_s12  ;;  %s1540_s12 = scalar_lea.sflag [#allocation5], %s2619_s16 }
 0x118   : > { %1825 = vmatmul.msk.bf16.gmra.mxu1 %vm611_vm0, %v655_v22  ;;  %v2031_v22 = vld [vmem:[%s3242_s6 + $0x44] sm:$0xf0] }
 0x128   : > { %1826 = vmatmul.msk.bf16.gmra.mxu1 %vm611_vm0, %v656_v23  ;;  %v1966_v23 = vor.u32 %v2031_v22, %v1965_v21 }
 0x12a   : > { %1231 = vmatpush.bf16.msrb.mxu3 %v1966_v23  ;;  %v2036_v23 = vld [vmem:[%s3242_s6 + $0x74] sm:$0xf] }
 0x160   : > { %v792_v61 = vpop.permute.xlu0 %791 }
 0x168   : > { %v794_v0 = vpop.permute.xlu0 %793 }
 0x170   : > { %v796_v1 = vpop.permute.xlu1 %795 }
 0x175   : > { %v714_v24 = vpop.f32.mrf.mxu1 }
 0x176   : > { %v715_v47 = vadd.f32 %v2147_v31, %v714_v24  ;;  %v800_v24 = vpop.permute.xlu2 %799 }
 0x178   : > { %v734_v51 = vmax.f32 %v715_v47, 0.0  ;;  %v798_v17 = vpop.permute.xlu1 %797 }
 0x17d   : > { %v716_v25 = vpop.f32.mrf.mxu1 }
 0x17e   : > { %v717_v44 = vadd.f32 %v2147_v31, %v716_v25 }
 0x180   : > { %v735_v49 = vmax.f32 %v717_v44, 0.0  ;;  %v804_v44 = vpop.permute.xlu0 %803 }
 0x182   : > { %v742_v52 = vpack.c.bf16 %v735_v49, %v734_v51  ;;  %v806_v49 = vpop.permute.xlu1 %805 }
 0x185   : > { %v719_v26 = vpop.f32.mrf.mxu1 }
 0x186   : > { %v720_v42 = vadd.f32 %v2147_v31, %v719_v26 }
 0x188   : > { %v736_v48 = vmax.f32 %v720_v42, 0.0 }
 0x18d   : > { %v721_v27 = vpop.f32.mrf.mxu1 }
 0x18e   : > { %v722_v39 = vadd.f32 %v2147_v31, %v721_v27 }
 0x190   : > { %v737_v45 = vmax.f32 %v722_v39, 0.0 }
 0x192   : > { %v743_v50 = vpack.c.bf16 %v737_v45, %v736_v48 }
 0x195   : > { %v724_v28 = vpop.f32.mrf.mxu1 }
 0x196   : > { %v725_v36 = vadd.f32 %v2147_v31, %v724_v28 }
 0x198   : > { %v738_v43 = vmax.f32 %v725_v36, 0.0  ;;  %v2025_v36 = vld [vmem:[%s3242_s6 + $0x14] sm:$0xf0] }
 0x19d   : > { %v726_v29 = vpop.f32.mrf.mxu1 }
 0x19e   : > { %v727_v34 = vadd.f32 %v2147_v31, %v726_v29  ;;  %v1957_v29 = vld [vmem:[%s3242_s6 + $0x30] sm:$0xf] }
 0x1a0   : > { %v739_v40 = vmax.f32 %v727_v34, 0.0 }
 0x1a2   : > { %v744_v46 = vpack.c.bf16 %v739_v40, %v738_v43  ;;  %v1933_v40 = vld [vmem:[%s3242_s6] sm:$0xf] }
 0x1a5   : > { %v729_v30 = vpop.f32.mrf.mxu1 }
 0x1a6   : > { %v730_v32 = vadd.f32 %v2147_v31, %v729_v30  ;;  %v2029_v30 = vld [vmem:[%s3242_s6 + $0x34] sm:$0xf0] }
 0x1a8   : > { %v740_v37 = vmax.f32 %v730_v32, 0.0  ;;  %v1949_v32 = vld [vmem:[%s3242_s6 + $0x20] sm:$0xf] }
 0x1ad   : > { %v731_v33 = vpop.f32.mrf.mxu1 }
 0x1ae   : > { %v732_v35 = vadd.f32 %v2147_v31, %v731_v33  ;;  %v1958_v31 = vor.u32 %v2029_v30, %v1957_v29  ;;  %v2027_v33 = vld [vmem:[%s3242_s6 + $0x24] sm:$0xf0]  ;;  %v2032_v29 = vld [vmem:[%s3242_s6 + $0x54] sm:$0xf] }
 0x1af   : > { %v1950_v34 = vor.u32 %v2027_v33, %v1949_v32  ;;  %v2030_v32 = vld [vmem:[%s3242_s6 + $0x44] sm:$0xf]  ;;  %v1967_v33 = vld [vmem:[%s3242_s6 + $0x48] sm:$0xf0] }
 0x1b0   : > { %v741_v38 = vmax.f32 %v732_v35, 0.0  ;;  %1232 = vmatpush.bf16.msrb.mxu3 %v1958_v31  ;;  %v1941_v35 = vld [vmem:[%s3242_s6 + $0x10] sm:$0xf]  ;;  %v1975_v31 = vld [vmem:[%s3242_s6 + $0x58] sm:$0xf0] }
 0x1b1   : > { %v1942_v39 = vor.u32 %v2025_v36, %v1941_v35  ;;  %v2028_v35 = vld [vmem:[%s3242_s6 + $0x34] sm:$0xf]  ;;  %v1959_v36 = vld [vmem:[%s3242_s6 + $0x38] sm:$0xf0] }
 0x1b2   : > { %v745_v41 = vpack.c.bf16 %v741_v38, %v740_v37  ;;  %v802_v38 = vpop.permute.xlu2 %801 }
 0x1b4   : > { %750 = vmatpush.bf16.msrb.mxu2 %v745_v41  ;;  %1233 = vmatpush.bf16.msrb.mxu3 %v1950_v34  ;;  %v2023_v41 = vld [vmem:[%s3242_s6 + $0x4] sm:$0xf0]  ;;  %v1970_v34 = vor.u32 %v2030_v32, %v1967_v33 }
 0x1b5   : > { %v1934_v42 = vor.u32 %v2023_v41, %v1933_v40  ;;  %v2024_v41 = vld [vmem:[%s3242_s6 + $0x14] sm:$0xf] }
 0x1b8   : > { %751 = vmatpush.bf16.msrb.mxu2 %v744_v46  ;;  %1234 = vmatpush.bf16.msrb.mxu3 %v1942_v39  ;;  %v1951_v39 = vld [vmem:[%s3242_s6 + $0x28] sm:$0xf0] }
 0x1bc   : > { %752 = vmatpush.bf16.msrb.mxu2 %v743_v50  ;;  %1235 = vmatpush.bf16.msrb.mxu3 %v1934_v42  ;;  %v1943_v42 = vld [vmem:[%s3242_s6 + $0x18] sm:$0xf0] }
 0x1c0   : > { %753 = vmatpush.bf16.msrb.mxu2 %v742_v52 }
 0x1c3   : > { %1827 = vmatmul.msk.bf16.vlgmr.msrb.gmra.mxu2 %vm611_vm0, %v2648_v5 }
 0x1d3   : > { %1828 = vmatmul.msk.bf16.gmra.mxu2 %vm611_vm0, %v2663_v8 }
 0x1e3   : > { %1829 = vmatmul.msk.bf16.gmra.mxu2 %vm611_vm0, %v2651_v6 }
 0x1f3   : > { %1830 = vmatmul.msk.bf16.gmra.mxu2 %vm611_vm0, %v2654_v7 }
 0x246   : > { %v755_v62 = vpop.f32.mrf.mxu2 }
 0x247   : > { %775 = vst.msk [vmem:[#allocation2] sm:$0xff] %vm611_vm0, %v755_v62 }
 0x248   : > { %816 = vst.msk [vmem:[#allocation2] sm:$0xff] %vm815_vm1, %v792_v61 }
 0x24e   : > { %v757_v63 = vpop.f32.mrf.mxu2 }
 0x24f   : > { %776 = vst.msk [vmem:[#allocation2 + $0x8] sm:$0xff] %vm611_vm0, %v757_v63  ;;  %v824_v3 = vld [vmem:[#allocation2] sm:$0xff] }
 0x250   : > { %817 = vst.msk [vmem:[#allocation2 + $0x8] sm:$0xff] %vm815_vm1, %v794_v0 }
 0x256   : > { %v760_v2 = vpop.f32.mrf.mxu2 }
 0x257   : > { %777 = vst.msk [vmem:[#allocation2 + $0x10] sm:$0xff] %vm611_vm0, %v760_v2  ;;  %v825_v4 = vld [vmem:[#allocation2 + $0x8] sm:$0xff] }
 0x258   : > { %818 = vst.msk [vmem:[#allocation2 + $0x10] sm:$0xff] %vm815_vm1, %v796_v1  ;;  %v2694_v9 = vpack.c.bf16 %v825_v4, %v824_v3 }
 0x25a   : > { %912 = vmatmul.bf16.vlgmr.msra.gmra.mxu3 %v2694_v9 }
 0x25e   : > { %v762_v16 = vpop.f32.mrf.mxu2 }
 0x25f   : > { %778 = vst.msk [vmem:[#allocation2 + $0x18] sm:$0xff] %vm611_vm0, %v762_v16  ;;  %v826_v26 = vld [vmem:[#allocation2 + $0x10] sm:$0xff] }
 0x260   : > { %819 = vst.msk [vmem:[#allocation2 + $0x18] sm:$0xff] %vm815_vm1, %v798_v17 }
 0x266   : > { %v765_v25 = vpop.f32.mrf.mxu2 }
 0x267   : > { %779 = vst.msk [vmem:[#allocation2 + $0x20] sm:$0xff] %vm611_vm0, %v765_v25  ;;  %v827_v27 = vld [vmem:[#allocation2 + $0x18] sm:$0xff] }
 0x268   : > { %820 = vst.msk [vmem:[#allocation2 + $0x20] sm:$0xff] %vm815_vm1, %v800_v24  ;;  %v2725_v28 = vpack.c.bf16 %v827_v27, %v826_v26  ;;  %v1991_v24 = vld [vmem:[%s3242_s6 + $0x78] sm:$0xf0]  ;;  %v2034_v26 = vld [vmem:[%s3242_s6 + $0x64] sm:$0xf] }
 0x269   : > { %v1994_v25 = vor.u32 %v2036_v23, %v1991_v24  ;;  %v1983_v27 = vld [vmem:[%s3242_s6 + $0x68] sm:$0xf0]  ;;  %v2040_v23 = vld [vmem:[%s3243_s7 + $0x14] sm:$0xf] }
 0x26a   : > { %917 = vmatmul.bf16.gmra.mxu3 %v2725_v28  ;;  %v1986_v30 = vor.u32 %v2034_v26, %v1983_v27  ;;  %v1869_v27 = vld [vmem:[%s3243_s7] sm:$0xf] }
 0x26e   : > { %v767_v37 = vpop.f32.mrf.mxu2 }
 0x26f   : > { %780 = vst.msk [vmem:[#allocation2 + $0x28] sm:$0xff] %vm611_vm0, %v767_v37  ;;  %v828_v45 = vld [vmem:[#allocation2 + $0x20] sm:$0xff]  ;;  %v1962_v37 = vor.u32 %v2028_v35, %v1959_v36 }
 0x270   : > { %821 = vst.msk [vmem:[#allocation2 + $0x28] sm:$0xff] %vm815_vm1, %v802_v38  ;;  %v2026_v38 = vld [vmem:[%s3242_s6 + $0x24] sm:$0xf] }
 0x271   : > { %v1954_v40 = vor.u32 %v2026_v38, %v1951_v39 }
 0x276   : > { %v770_v43 = vpop.f32.mrf.mxu2 }
 0x277   : > { %781 = vst.msk [vmem:[#allocation2 + $0x30] sm:$0xff] %vm611_vm0, %v770_v43  ;;  %v829_v46 = vld [vmem:[#allocation2 + $0x28] sm:$0xff]  ;;  %v2022_v43 = vld [vmem:[%s3242_s6 + $0x4] sm:$0xf] }
 0x278   : > { %822 = vst.msk [vmem:[#allocation2 + $0x30] sm:$0xff] %vm815_vm1, %v804_v44  ;;  %v2756_v47 = vpack.c.bf16 %v829_v46, %v828_v45  ;;  %v1935_v44 = vld [vmem:[%s3242_s6 + $0x8] sm:$0xf0]  ;;  %v2052_v46 = vld [vmem:[%s3243_s7 + $0x74] sm:$0xf] }
 0x279   : > { %v1938_v45 = vor.u32 %v2022_v43, %v1935_v44 }
 0x27a   : > { %922 = vmatmul.bf16.gmra.mxu3 %v2756_v47 }
 0x27e   : > { %v772_v48 = vpop.f32.mrf.mxu2 }
 0x27f   : > { %782 = vst.msk [vmem:[#allocation2 + $0x38] sm:$0xff] %vm611_vm0, %v772_v48  ;;  %v830_v50 = vld [vmem:[#allocation2 + $0x30] sm:$0xff]  ;;  %v1927_v48 = vld [vmem:[%s3243_s7 + $0x78] sm:$0xf0] }
 0x280   : > { %823 = vst.msk [vmem:[#allocation2 + $0x38] sm:$0xff] %vm815_vm1, %v806_v49  ;;  %v1930_v49 = vor.u32 %v2052_v46, %v1927_v48 }
 0x282   : > { %1119 = vmatpush.bf16.msra.mxu2 %v1930_v49 }
 0x287   : > { %v831_v51 = vld [vmem:[#allocation2 + $0x38] sm:$0xff] }
 0x288   : > { %v2761_v52 = vpack.c.bf16 %v831_v51, %v830_v50  ;;  %v2050_v50 = vld [vmem:[%s3243_s7 + $0x64] sm:$0xf] }
 0x28a   : > { %927 = vmatmul.bf16.gmra.mxu3 %v2761_v52 }
 0x29a   : > { %1236 = vmatmul.bf16.vlgmr.msrb.gmra.mxu3 %v2694_v9 }
 0x2aa   : > { %1241 = vmatmul.bf16.gmra.mxu3 %v2725_v28 }
 0x2ba   : > { %1246 = vmatmul.bf16.gmra.mxu3 %v2756_v47 }
 0x2ca   : > { %1251 = vmatmul.bf16.gmra.mxu3 %v2761_v52 }
 0x2dd   : > { %v913_v53 = vpop.f32.mrf.mxu3 }
 0x2de   : > { %v914_v17 = vadd.f32 %v2148_v60, %v913_v53  ;;  %v2053_v53 = vld [vmem:[%s3243_s7 + $0x74] sm:$0xf0] }
 0x2e0   : > { %v933_v21 = vmax.f32 %v914_v17, 0.0  ;;  %v2042_v17 = vld [vmem:[%s3243_s7 + $0x24] sm:$0xf] }
 0x2e5   : > { %v915_v54 = vpop.f32.mrf.mxu3 }
 0x2e6   : > { %v916_v14 = vadd.f32 %v2148_v60, %v915_v54  ;;  %v1911_v54 = vld [vmem:[%s3243_s7 + $0x58] sm:$0xf0] }
 0x2e8   : > { %v934_v19 = vmax.f32 %v916_v14, 0.0 }
 0x2ea   : > { %v941_v22 = vpack.c.bf16 %v934_v19, %v933_v21  ;;  %v1887_v19 = vld [vmem:[%s3243_s7 + $0x28] sm:$0xf0]  ;;  %v1877_v21 = vld [vmem:[%s3243_s7 + $0x10] sm:$0xf] }
 0x2ed   : > { %v918_v55 = vpop.f32.mrf.mxu3 }
 0x2ee   : > { %v919_v12 = vadd.f32 %v2148_v60, %v918_v55 }
 0x2f0   : > { %v935_v18 = vmax.f32 %v919_v12, 0.0  ;;  %v1895_v12 = vld [vmem:[%s3243_s7 + $0x38] sm:$0xf0] }
 0x2f5   : > { %v920_v56 = vpop.f32.mrf.mxu3 }
 0x2f6   : > { %v921_v4 = vadd.f32 %v2148_v60, %v920_v56  ;;  %v1917_v56 = vld [vmem:[%s3243_s7 + $0x60] sm:$0xf] }
 0x2f8   : > { %v936_v15 = vmax.f32 %v921_v4, 0.0 }
 0x2fa   : > { %v942_v20 = vpack.c.bf16 %v936_v15, %v935_v18  ;;  %v1885_v15 = vld [vmem:[%s3243_s7 + $0x20] sm:$0xf] }
 0x2fd   : > { %v923_v57 = vpop.f32.mrf.mxu3 }
 0x2fe   : > { %v924_v1 = vadd.f32 %v2148_v60, %v923_v57  ;;  %v2051_v57 = vld [vmem:[%s3243_s7 + $0x64] sm:$0xf0] }
 0x300   : > { %v937_v13 = vmax.f32 %v924_v1, 0.0  ;;  %v1901_v1 = vld [vmem:[%s3243_s7 + $0x40] sm:$0xf] }
 0x305   : > { %v925_v58 = vpop.f32.mrf.mxu3 }
 0x306   : > { %v926_v63 = vadd.f32 %v2148_v60, %v925_v58 }
 0x308   : > { %v938_v10 = vmax.f32 %v926_v63, 0.0  ;;  %v2046_v63 = vld [vmem:[%s3243_s7 + $0x44] sm:$0xf] }
 0x30a   : > { %v943_v16 = vpack.c.bf16 %v938_v10, %v937_v13  ;;  %v2045_v10 = vld [vmem:[%s3243_s7 + $0x34] sm:$0xf0] }
 0x30d   : > { %v928_v59 = vpop.f32.mrf.mxu3 }
 0x30e   : > { %v929_v61 = vadd.f32 %v2148_v60, %v928_v59  ;;  %v1918_v59 = vor.u32 %v2051_v57, %v1917_v56  ;;  %v1463_v56 = vld [vmem:[%s3245_s9 + $0x70] sm:$0xff]  ;;  %v1462_v57 = vld [vmem:[%s3245_s9 + $0x68] sm:$0xff] }
 0x310   : > { %v939_v2 = vmax.f32 %v929_v61, 0.0  ;;  %v2049_v61 = vld [vmem:[%s3243_s7 + $0x54] sm:$0xf0] }
 0x315   : > { %v930_v62 = vpop.f32.mrf.mxu3 }
 0x316   : > { %v931_v0 = vadd.f32 %v2148_v60, %v930_v62  ;;  %v1909_v60 = vld [vmem:[%s3243_s7 + $0x50] sm:$0xf] }
 0x317   : > { %v1910_v62 = vor.u32 %v2049_v61, %v1909_v60 }
 0x318   : > { %v940_v3 = vmax.f32 %v931_v0, 0.0  ;;  %v1903_v0 = vld [vmem:[%s3243_s7 + $0x48] sm:$0xf0] }
 0x31a   : > { %v944_v11 = vpack.c.bf16 %v940_v3, %v939_v2  ;;  %v1906_v2 = vor.u32 %v2046_v63, %v1903_v0  ;;  %v2047_v3 = vld [vmem:[%s3243_s7 + $0x44] sm:$0xf0]  ;;  %v1460_v0 = vld [vmem:[%s3245_s9 + $0x58] sm:$0xff] }
 0x31b   : > { %v1902_v4 = vor.u32 %v2047_v3, %v1901_v1  ;;  %v1476_v3 = vld [vmem:[%s3245_s9 + $0xd8] sm:$0xff] }
 0x31c   : > { %949 = vmatpush.bf16.msrb.mxu0 %v944_v11  ;;  %v2044_v11 = vld [vmem:[%s3243_s7 + $0x34] sm:$0xf] }
 0x31d   : > { %v1898_v13 = vor.u32 %v2044_v11, %v1895_v12  ;;  %v1475_v12 = vld [vmem:[%s3245_s9 + $0xd0] sm:$0xff] }
 0x320   : > { %950 = vmatpush.bf16.msrb.mxu0 %v943_v16  ;;  %v2043_v16 = vld [vmem:[%s3243_s7 + $0x24] sm:$0xf0] }
 0x321   : > { %v1886_v18 = vor.u32 %v2043_v16, %v1885_v15  ;;  %v1456_v16 = vld [vmem:[%s3245_s9 + $0x38] sm:$0xff] }
 0x324   : > { %951 = vmatpush.bf16.msrb.mxu0 %v942_v20  ;;  %v1890_v20 = vor.u32 %v2042_v17, %v1887_v19  ;;  %v1455_v19 = vld [vmem:[%s3245_s9 + $0x30] sm:$0xff] }
 0x328   : > { %952 = vmatpush.bf16.msrb.mxu0 %v941_v22  ;;  %v2041_v22 = vld [vmem:[%s3243_s7 + $0x14] sm:$0xf0] }
 0x329   : > { %v1878_v24 = vor.u32 %v2041_v22, %v1877_v21  ;;  %v1473_v21 = vld [vmem:[%s3245_s9 + $0xc0] sm:$0xff]  ;;  %v1454_v22 = vld [vmem:[%s3245_s9 + $0x28] sm:$0xff] }
 0x32b   : > { %1863 = vmatmul.msk.bf16.vlgmr.msrb.gmra.mxu0 %vm611_vm0, %v2648_v5  ;;  %v1978_v5 = vor.u32 %v2032_v29, %v1975_v31  ;;  %v2039_v29 = vld [vmem:[%s3243_s7 + $0x4] sm:$0xf0] }
 0x32c   : > { %1257 = vmatpush.bf16.msra.mxu0 %v1994_v25  ;;  %v1879_v25 = vld [vmem:[%s3243_s7 + $0x18] sm:$0xf0]  ;;  %v1870_v31 = vor.u32 %v2039_v29, %v1869_v27 }
 0x32d   : > { %v1882_v26 = vor.u32 %v2040_v23, %v1879_v25  ;;  %v1453_v23 = vld [vmem:[%s3245_s9 + $0x20] sm:$0xff] }
 0x32e   : > { %v1286_v25 = vld [vmem:[%s3244_s8] sm:$0x3] }
 0x330   : > { %1258 = vmatpush.bf16.msra.mxu0 %v1986_v30  ;;  %v2038_v30 = vld [vmem:[%s3243_s7 + $0x4] sm:$0xf] }
 0x334   : > { %1259 = vmatpush.bf16.msra.mxu0 %v1978_v5  ;;  %v1871_v5 = vld [vmem:[%s3243_s7 + $0x8] sm:$0xf0] }
 0x338   : > { %1260 = vmatpush.bf16.msra.mxu0 %v1970_v34 }
 0x33b   : > { %1864 = vmatmul.msk.bf16.gmra.mxu0 %vm611_vm0, %v2663_v8  ;;  %v1946_v8 = vor.u32 %v2024_v41, %v1943_v42 }
 0x33c   : > { %1261 = vmatpush.bf16.msra.mxu0 %v1962_v37 }
 0x340   : > { %1262 = vmatpush.bf16.msra.mxu0 %v1954_v40 }
 0x344   : > { %1263 = vmatpush.bf16.msra.mxu0 %v1946_v8 }
 0x348   : > { %1264 = vmatpush.bf16.msra.mxu0 %v1938_v45 }
 0x34b   : > { %1865 = vmatmul.msk.bf16.gmra.mxu0 %vm611_vm0, %v2651_v6  ;;  %v1919_v6 = vld [vmem:[%s3243_s7 + $0x68] sm:$0xf0] }
 0x34c   : > { %v1922_v51 = vor.u32 %v2050_v50, %v1919_v6 }
 0x34e   : > { %1120 = vmatpush.bf16.msra.mxu2 %v1922_v51 }
 0x35b   : > { %1866 = vmatmul.msk.bf16.gmra.mxu0 %vm611_vm0, %v2654_v7  ;;  %v1925_v7 = vld [vmem:[%s3243_s7 + $0x70] sm:$0xf] }
 0x35c   : > { %v1926_v55 = vor.u32 %v2053_v53, %v1925_v7  ;;  %v1480_v7 = vld [vmem:[%s3245_s9 + $0xf8] sm:$0xff] }
 0x35d   : > { %v1464_v53 = vld [vmem:[%s3245_s9 + $0x78] sm:$0xff] }
 0x35e   : > { %1090 = vmatpush.bf16.msra.mxu1 %v1926_v55 }
 0x362   : > { %1091 = vmatpush.bf16.msra.mxu1 %v1918_v59  ;;  %v1461_v59 = vld [vmem:[%s3245_s9 + $0x60] sm:$0xff] }
 0x366   : > { %1092 = vmatpush.bf16.msra.mxu1 %v1910_v62  ;;  %v1477_v62 = vld [vmem:[%s3245_s9 + $0xe0] sm:$0xff] }
 0x36a   : > { %1093 = vmatpush.bf16.msra.mxu1 %v1902_v4 }
 0x36b   : > { %1265 = vmatmul.bf16.vlgmr.msra.gmra.mxu0 %v2694_v9  ;;  %v2048_v9 = vld [vmem:[%s3243_s7 + $0x54] sm:$0xf] }
 0x36c   : > { %v1914_v58 = vor.u32 %v2048_v9, %v1911_v54  ;;  %v1479_v9 = vld [vmem:[%s3245_s9 + $0xf0] sm:$0xff] }
 0x36e   : > { %1121 = vmatpush.bf16.msra.mxu2 %v1914_v58  ;;  %v1478_v58 = vld [vmem:[%s3245_s9 + $0xe8] sm:$0xff] }
 0x372   : > { %1122 = vmatpush.bf16.msra.mxu2 %v1906_v2  ;;  %v1459_v2 = vld [vmem:[%s3245_s9 + $0x50] sm:$0xff] }
 0x376   : > { %1123 = vmatpush.bf16.msra.mxu2 %v1898_v13 }
 0x37a   : > { %1124 = vmatpush.bf16.msra.mxu2 %v1890_v20 }
 0x37b   : > { %1270 = vmatmul.bf16.gmra.mxu0 %v2725_v28  ;;  %v1893_v28 = vld [vmem:[%s3243_s7 + $0x30] sm:$0xf] }
 0x37c   : > { %v1894_v14 = vor.u32 %v2045_v10, %v1893_v28  ;;  %v1458_v28 = vld [vmem:[%s3245_s9 + $0x48] sm:$0xff] }
 0x37e   : > { %1094 = vmatpush.bf16.msra.mxu1 %v1894_v14  ;;  %1125 = vmatpush.bf16.msra.mxu2 %v1882_v26  ;;  %v1457_v14 = vld [vmem:[%s3245_s9 + $0x40] sm:$0xff] }
 0x382   : > { %1095 = vmatpush.bf16.msra.mxu1 %v1886_v18  ;;  %v1474_v18 = vld [vmem:[%s3245_s9 + $0xc8] sm:$0xff] }
 0x386   : > { %1096 = vmatpush.bf16.msra.mxu1 %v1878_v24  ;;  %v1472_v24 = vld [vmem:[%s3245_s9 + $0xb8] sm:$0xff] }
 0x38a   : > { %1097 = vmatpush.bf16.msra.mxu1 %v1870_v31  ;;  %v1471_v31 = vld [vmem:[%s3245_s9 + $0xb0] sm:$0xff] }
 0x38b   : > { %1275 = vmatmul.bf16.gmra.mxu0 %v2756_v47  ;;  %v1874_v47 = vor.u32 %v2038_v30, %v1871_v5  ;;  %v1452_v30 = vld [vmem:[%s3245_s9 + $0x18] sm:$0xff] }
 0x38d   : > { %1126 = vmatpush.bf16.msra.mxu2 %v1874_v47 }
 0x38e   : > { %1482 = vmatpush.msrb.mxu1 %v1464_v53  ;;  %v1468_v53 = vld [vmem:[%s3245_s9 + $0x98] sm:$0xff] }
 0x390   : > { %1483 = vmatpush.msrb.mxu1 %v1463_v56 }
 0x391   : > { %1502 = vmatpush.msrb.mxu2 %v1480_v7  ;;  %v1449_v7 = vld [vmem:[%s3245_s9] sm:$0xff] }
 0x392   : > { %1484 = vmatpush.msrb.mxu1 %v1462_v57 }
 0x393   : > { %1503 = vmatpush.msrb.mxu2 %v1479_v9  ;;  %v1289_v9 = vperm.slane %v1286_v25, 1 }
 0x394   : > { %1485 = vmatpush.msrb.mxu1 %v1461_v59 }
 0x395   : > { %1504 = vmatpush.msrb.mxu2 %v1478_v58 }
 0x396   : > { %1486 = vmatpush.msrb.mxu1 %v1460_v0 }
 0x397   : > { %1505 = vmatpush.msrb.mxu2 %v1477_v62 }
 0x398   : > { %1487 = vmatpush.msrb.mxu1 %v1459_v2  ;;  %v1466_v2 = vld [vmem:[%s3245_s9 + $0x88] sm:$0xff] }
 0x399   : > { %1506 = vmatpush.msrb.mxu2 %v1476_v3 }
 0x39a   : > { %1488 = vmatpush.msrb.mxu1 %v1458_v28 }
 0x39b   : > { %1280 = vmatmul.bf16.gmra.mxu0 %v2761_v52  ;;  %v2927_v52 = vpop.f32.mrf.mxu3  ;;  %1507 = vmatpush.msrb.mxu2 %v1475_v12 }
 0x39c   : > { %1489 = vmatpush.msrb.mxu1 %v1457_v14 }
 0x39d   : > { %1508 = vmatpush.msrb.mxu2 %v1474_v18 }
 0x39e   : > { %1490 = vmatpush.msrb.mxu1 %v1456_v16 }
 0x39f   : > { %1509 = vmatpush.msrb.mxu2 %v1473_v21 }
 0x3a0   : > { %1491 = vmatpush.msrb.mxu1 %v1455_v19 }
 0x3a1   : > { %1510 = vmatpush.msrb.mxu2 %v1472_v24 }
 0x3a2   : > { %1492 = vmatpush.msrb.mxu1 %v1454_v22 }
 0x3a3   : > { %v2931_v44 = vpop.f32.mrf.mxu3  ;;  %1511 = vmatpush.msrb.mxu2 %v1471_v31 }
 0x3a4   : > { %1493 = vmatpush.msrb.mxu1 %v1453_v23 }
 0x3a6   : > { %1494 = vmatpush.msrb.mxu1 %v1452_v30 }
 0x3a8   : > { %v954_v32 = vpop.f32.mrf.mxu0 }
 0x3ab   : > { %v1242_v48 = vpop.f32.mrf.mxu3 }
 0x3b0   : > { %v956_v33 = vpop.f32.mrf.mxu0 }
 0x3b1   : > { %v990_v34 = vpack.c.bf16 %v956_v33, %v954_v32  ;;  %v1288_v32 = vperm.slane %v1286_v25, 0 }
 0x3b3   : > { %1098 = vmatmul.bf16.vlgmr.msra.gmra.mxu1 %v990_v34  ;;  %1127 = vmatmul.bf16.vlgmr.msra.gmra.mxu2 %v990_v34  ;;  %v1244_v54 = vpop.f32.mrf.mxu3 }
 0x3b8   : > { %v959_v35 = vpop.f32.mrf.mxu0 }
 0x3bb   : > { %v1247_v1 = vpop.f32.mrf.mxu3 }
 0x3c0   : > { %v961_v36 = vpop.f32.mrf.mxu0 }
 0x3c1   : > { %v991_v37 = vpack.c.bf16 %v961_v36, %v959_v35  ;;  %v1451_v35 = vld [vmem:[%s3245_s9 + $0x10] sm:$0xff]  ;;  %v1470_v36 = vld [vmem:[%s3245_s9 + $0xa8] sm:$0xff] }
 0x3c2   : > { %1495 = vmatpush.msrb.mxu1 %v1451_v35  ;;  %1512 = vmatpush.msrb.mxu2 %v1470_v36 }
 0x3c3   : > { %1103 = vmatmul.bf16.gmra.mxu1 %v991_v37  ;;  %1132 = vmatmul.bf16.gmra.mxu2 %v991_v37  ;;  %v1249_v13 = vpop.f32.mrf.mxu3 }
 0x3c8   : > { %v964_v38 = vpop.f32.mrf.mxu0 }
 0x3cb   : > { %v1252_v26 = vpop.f32.mrf.mxu3 }
 0x3d0   : > { %v966_v39 = vpop.f32.mrf.mxu0 }
 0x3d1   : > { %v992_v40 = vpack.c.bf16 %v966_v39, %v964_v38 }
 0x3d3   : > { %1108 = vmatmul.bf16.gmra.mxu1 %v992_v40  ;;  %1137 = vmatmul.bf16.gmra.mxu2 %v992_v40  ;;  %v1450_v40 = vld [vmem:[%s3245_s9 + $0x8] sm:$0xff]  ;;  %v1254_v0 = vpop.f32.mrf.mxu3 }
 0x3d4   : > { %1496 = vmatpush.msrb.mxu1 %v1450_v40 }
 0x3d6   : > { %1497 = vmatpush.msrb.mxu1 %v1449_v7 }
 0x3d8   : > { %v969_v41 = vpop.f32.mrf.mxu0 }
 0x3e0   : > { %v971_v42 = vpop.f32.mrf.mxu0 }
 0x3e1   : > { %v993_v8 = vpack.c.bf16 %v971_v42, %v969_v41  ;;  %v1469_v41 = vld [vmem:[%s3245_s9 + $0xa0] sm:$0xff] }
 0x3e2   : > { %1513 = vmatpush.msrb.mxu2 %v1469_v41 }
 0x3e3   : > { %1113 = vmatmul.bf16.gmra.mxu1 %v993_v8  ;;  %1142 = vmatmul.bf16.gmra.mxu2 %v993_v8 }
 0x3e4   : > { %1514 = vmatpush.msrb.mxu2 %v1468_v53 }
 0x3e8   : > { %v2929_v43 = vpop.f32.mrf.mxu0 }
 0x3f0   : > { %v2935_v46 = vpop.f32.mrf.mxu0 }
 0x3f8   : > { %v2941_v6 = vpop.f32.mrf.mxu0 }
 0x400   : > { %v2966_v60 = vpop.f32.mrf.mxu0 }
 0x408   : > { %v2985_v10 = vpop.f32.mrf.mxu0 }
 0x410   : > { %v1278_v20 = vpop.f32.mrf.mxu0 }
 0x430   : > { %v2933_v45 = vpop.f32.mrf.mxu1 }
 0x431   : > { %v1238_v47 = vadd.f32 %v2927_v52, %v2933_v45  ;;  %v1281_v52 = vpop.f32.mrf.mxu0 }
 0x436   : > { %v2937_v49 = vpop.f32.mrf.mxu2 }
 0x438   : > { %v2939_v50 = vpop.f32.mrf.mxu1 }
 0x439   : > { %v1240_v33 = vadd.f32 %v2931_v44, %v2939_v50  ;;  %v3043_v44 = vadd.f32 %v1288_v32, %v1238_v47 }
 0x43b   : > { %v3045_v45 = vadd.f32 %v1288_v32, %v1240_v33 }
 0x43e   : > { %v2946_v51 = vpop.f32.mrf.mxu2 }
 0x43f   : > { %v1269_v56 = vadd.f32 %v2935_v46, %v2946_v51  ;;  %v1310_v46 = vmax.f32 %v3045_v45, 0.0 }
 0x440   : > { %v1104_v55 = vpop.f32.mrf.mxu1 }
 0x441   : > { %v1243_v27 = vadd.f32 %v1242_v48, %v1104_v55  ;;  %v3085_v12 = vadd.f32 %v1289_v9, %v1269_v56 }
 0x443   : > { %v3033_v39 = vadd.f32 %v1288_v32, %v1243_v27 }
 0x445   : > { %v1312_v57 = vmax.f32 %v3033_v39, 0.0 }
 0x446   : > { %v2968_v61 = vpop.f32.mrf.mxu2 }
 0x447   : > { %v1272_v48 = vadd.f32 %v2941_v6, %v2968_v61  ;;  %v1267_v6 = vadd.f32 %v2929_v43, %v2937_v49  ;;  %v1308_v43 = vmax.f32 %v3043_v44, 0.0 }
 0x448   : > { %v1106_v63 = vpop.f32.mrf.mxu1 }
 0x449   : > { %v1245_v5 = vadd.f32 %v1244_v54, %v1106_v63  ;;  %v3074_v49 = vadd.f32 %v1289_v9, %v1272_v48  ;;  %v1350_v48 = vlaneseq }
 0x44b   : > { %v3041_v42 = vadd.f32 %v1288_v32, %v1245_v5 }
 0x44d   : > { %v1314_v61 = vmax.f32 %v3041_v42, 0.0 }
 0x44e   : > { %v1135_v4 = vpop.f32.mrf.mxu2 }
 0x44f   : > { %v1274_v50 = vadd.f32 %v2966_v60, %v1135_v4  ;;  %v1467_v60 = vld [vmem:[%s3245_s9 + $0x90] sm:$0xff]  ;;  %v1325_v16 = vmax.f32 %v1310_v46, %v1314_v61 }
 0x450   : > { %v1109_v11 = vpop.f32.mrf.mxu1  ;;  %1515 = vmatpush.msrb.mxu2 %v1467_v60 }
 0x451   : > { %v1248_v37 = vadd.f32 %v1247_v1, %v1109_v11  ;;  %v3076_v51 = vadd.f32 %v1289_v9, %v1274_v50  ;;  %v3083_v11 = vadd.f32 %v1289_v9, %v1267_v6 }
 0x452   : > { %1516 = vmatpush.msrb.mxu2 %v1466_v2 }
 0x453   : > { %v3056_v54 = vadd.f32 %v1288_v32, %v1248_v37  ;;  %v1315_v21 = vmax.f32 %v3076_v51, 0.0  ;;  %v1309_v27 = vmax.f32 %v3083_v11, 0.0 }
 0x455   : > { %v1316_v3 = vmax.f32 %v3056_v54, 0.0  ;;  %v1351_v54 = vshrl.u32 %v1350_v48, 7 }
 0x456   : > { %v1138_v15 = vpop.f32.mrf.mxu2 }
 0x457   : > { %v1277_v58 = vadd.f32 %v2985_v10, %v1138_v15  ;;  %v1465_v15 = vld [vmem:[%s3245_s9 + $0x80] sm:$0xff]  ;;  %v1353_v60 = vadd.s32 16, %v1351_v54 }
 0x458   : > { %v1111_v17 = vpop.f32.mrf.mxu1  ;;  %1517 = vmatpush.msrb.mxu2 %v1465_v15  ;;  %v1357_v15 = vadd.s32 48, %v1351_v54 }
 0x459   : > { %v1250_v38 = vadd.f32 %v1249_v13, %v1111_v17  ;;  %v1324_v13 = vmax.f32 %v1308_v43, %v1312_v57  ;;  %v3089_v14 = vadd.f32 %v1289_v9, %v1277_v58 }
 0x45b   : > { %v3058_v55 = vadd.f32 %v1288_v32, %v1250_v38  ;;  %v1326_v22 = vmax.f32 %v1324_v13, %v1316_v3  ;;  %v1317_v30 = vmax.f32 %v3089_v14, 0.0 }
 0x45d   : > { %v1318_v28 = vmax.f32 %v3058_v55, 0.0 }
 0x45e   : > { %v1140_v29 = vpop.f32.mrf.mxu2 }
 0x45f   : > { %v1279_v62 = vadd.f32 %v1278_v20, %v1140_v29  ;;  %v1313_v20 = vmax.f32 %v3074_v49, 0.0  ;;  %v1327_v23 = vmax.f32 %v1325_v16, %v1318_v28  ;;  %v1311_v29 = vmax.f32 %v3085_v12, 0.0 }
 0x460   : > { %v1114_v34 = vpop.f32.mrf.mxu1  ;;  %v1358_v16 = vadd.s32 56, %v1351_v54 }
 0x461   : > { %v1253_v8 = vadd.f32 %v1252_v26, %v1114_v34  ;;  %v3096_v17 = vadd.f32 %v1289_v9, %v1279_v62  ;;  %v1283_v26 = vpop.f32.mrf.mxu0  ;;  %v1337_v34 = vmax.f32 %v1309_v27, %v1313_v20  ;;  %v1338_v35 = vmax.f32 %v1311_v29, %v1315_v21 }
 0x462   : > { %v1354_v62 = vadd.s32 24, %v1351_v54 }
 0x463   : > { %v3070_v63 = vadd.f32 %v1288_v32, %v1253_v8  ;;  %v1319_v5 = vmax.f32 %v3096_v17, 0.0  ;;  %v1339_v40 = vmax.f32 %v1337_v34, %v1317_v30 }
 0x465   : > { %v1320_v18 = vmax.f32 %v3070_v63, 0.0  ;;  %v1340_v41 = vmax.f32 %v1338_v35, %v1319_v5 }
 0x466   : > { %v1143_v59 = vpop.f32.mrf.mxu2 }
 0x467   : > { %v1282_v4 = vadd.f32 %v1281_v52, %v1143_v59  ;;  %v1328_v47 = vmax.f32 %v1326_v22, %v1320_v18  ;;  %v1352_v59 = vadd.s32 8, %v1351_v54 }
 0x468   : > { %v1116_v1 = vpop.f32.mrf.mxu1 }
 0x469   : > { %v1255_v10 = vadd.f32 %v1254_v0, %v1116_v1  ;;  %v3101_v24 = vadd.f32 %v1289_v9, %v1282_v4  ;;  %v1355_v0 = vadd.s32 32, %v1351_v54  ;;  %v1356_v1 = vadd.s32 40, %v1351_v54 }
 0x46b   : > { %v1306_v19 = vadd.f32 %v1288_v32, %v1255_v10  ;;  %v1321_v36 = vmax.f32 %v3101_v24, 0.0 }
 0x46d   : > { %v1322_v25 = vmax.f32 %v1306_v19, 0.0  ;;  %v1341_v44 = vmax.f32 %v1339_v40, %v1321_v36 }
 0x46e   : > { %v1145_v31 = vpop.f32.mrf.mxu2 }
 0x46f   : > { %v1329_v32 = vmax.f32 %v1327_v23, %v1322_v25  ;;  %v1284_v33 = vadd.f32 %v1283_v26, %v1145_v31 }
 0x471   : > { %v1330_v37 = vmax.f32 %v1328_v47, %v1329_v32  ;;  %v3116_v38 = vadd.f32 %v1289_v9, %v1284_v33 }
 0x473   : > { %v1331_v8 = vrot.slane %v1330_v37, 4  ;;  %v1323_v52 = vmax.f32 %v3116_v38, 0.0 }
 0x475   : > { %v1332_v45 = vmax.f32 %v1330_v37, %v1331_v8  ;;  %v1342_v50 = vmax.f32 %v1340_v41, %v1323_v52 }
 0x477   : > { %v1333_v7 = vrot.slane %v1332_v45, 2  ;;  %v1343_v53 = vmax.f32 %v1341_v44, %v1342_v50 }
 0x479   : > { %v1334_v9 = vmax.f32 %v1332_v45, %v1333_v7  ;;  %v1344_v55 = vrot.slane %v1343_v53, 4  ;;  %v1438_v45 = vstv %s1995_s4  ;;  %s1570_s4 = scalar_lea.hbm %s3289_s30, %s2511_s29 }
 0x47b   : > { %v1335_v6 = vrot.slane %v1334_v9, 1  ;;  %v1345_v56 = vmax.f32 %v1343_v53, %v1344_v55 }
 0x47d   : > { %v1336_v58 = vmax.f32 %v1334_v9, %v1335_v6  ;;  %v1346_v63 = vrot.slane %v1345_v56, 2 }
 0x47f   : > { %vm1359_vm2 = vcmp.eq.f32.partialorder %v1308_v43, %v1336_v58  ;;  %vm1361_vm3 = vcmp.eq.f32.partialorder %v1310_v46, %v1336_v58  ;;  %vm1363_vm4 = vcmp.eq.f32.partialorder %v1312_v57, %v1336_v58  ;;  %vm1365_vm5 = vcmp.eq.f32.partialorder %v1314_v61, %v1336_v58  ;;  %1498 = vmatmul.f32.vlgmr.msrb.gmra.mxu1 %v1336_v58 }
 0x480   : > { %vm1367_vm6 = vcmp.eq.f32.partialorder %v1316_v3, %v1336_v58  ;;  %vm1369_vm7 = vcmp.eq.f32.partialorder %v1318_v28, %v1336_v58  ;;  %v1375_v2 = vsel %vm1359_vm2, %v1351_v54, 64  ;;  %v1377_v4 = vsel %vm1361_vm3, %v1352_v59, 64 }
 0x481   : > { %v1379_v10 = vsel %vm1363_vm4, %v1353_v60, 64  ;;  %v1381_v13 = vsel %vm1365_vm5, %v1354_v62, 64  ;;  %vm1371_vm8 = vcmp.eq.f32.partialorder %v1320_v18, %v1336_v58  ;;  %vm1373_vm9 = vcmp.eq.f32.partialorder %v1322_v25, %v1336_v58 }
 0x482   : > { %vm1391_vm10 = vcmp.lt.s32.totalorder %v1375_v2, %v1379_v10  ;;  %vm1393_vm11 = vcmp.lt.s32.totalorder %v1377_v4, %v1381_v13  ;;  %v1347_v39 = vmax.f32 %v1345_v56, %v1346_v63  ;;  %v1383_v57 = vsel %vm1367_vm6, %v1355_v0, 64 }
 0x483   : > { %v1385_v43 = vsel %vm1369_vm7, %v1356_v1, 64  ;;  %v1392_v42 = vsel %vm1391_vm10, %v1375_v2, %v1379_v10  ;;  %v1394_v61 = vsel %vm1393_vm11, %v1377_v4, %v1381_v13  ;;  %v1387_v3 = vsel %vm1371_vm8, %v1357_v15, 64 }
 0x484   : > { %vm1395_vm12 = vcmp.lt.s32.totalorder %v1392_v42, %v1383_v57  ;;  %vm1397_vm13 = vcmp.lt.s32.totalorder %v1394_v61, %v1385_v43  ;;  %v1348_v46 = vrot.slane %v1347_v39, 1  ;;  %v1389_v28 = vsel %vm1373_vm9, %v1358_v16, 64 }
 0x485   : > { %v1396_v19 = vsel %vm1395_vm12, %v1392_v42, %v1383_v57  ;;  %v1398_v22 = vsel %vm1397_vm13, %v1394_v61, %v1385_v43 }
 0x486   : > { %vm1399_vm14 = vcmp.lt.s32.totalorder %v1396_v19, %v1387_v3  ;;  %vm1401_vm15 = vcmp.lt.s32.totalorder %v1398_v22, %v1389_v28  ;;  %v1349_v23 = vmax.f32 %v1347_v39, %v1348_v46 }
 0x487   : > { %v1400_v26 = vsel %vm1399_vm14, %v1396_v19, %v1387_v3  ;;  %v1402_v18 = vsel %vm1401_vm15, %v1398_v22, %v1389_v28 }
 0x488   : > { %vm1403_vm0 = vcmp.lt.s32.totalorder %v1400_v26, %v1402_v18  ;;  %vm1360_vm1 = vcmp.eq.f32.partialorder %v1309_v27, %v1349_v23  ;;  %vm1362_vm2 = vcmp.eq.f32.partialorder %v1311_v29, %v1349_v23  ;;  %vm1364_vm3 = vcmp.eq.f32.partialorder %v1313_v20, %v1349_v23  ;;  %1518 = vmatmul.f32.vlgmr.msrb.gmra.mxu2 %v1349_v23 }
 0x489   : > { %v1404_v25 = vsel %vm1403_vm0, %v1400_v26, %v1402_v18  ;;  %vm1366_vm4 = vcmp.eq.f32.partialorder %v1315_v21, %v1349_v23  ;;  %vm1368_vm5 = vcmp.eq.f32.partialorder %v1317_v30, %v1349_v23  ;;  %v1376_v47 = vsel %vm1360_vm1, %v1351_v54, 64  ;;  %v1481_v54 = vld [vmem:[%s3286_s14] sm:$0x1] }
 0x48a   : > { %v1405_v31 = vrot.slane %v1404_v25, 4  ;;  %vm1370_vm6 = vcmp.eq.f32.partialorder %v1319_v5, %v1349_v23  ;;  %v1378_v11 = vsel %vm1362_vm2, %v1352_v59, 64  ;;  %v1380_v27 = vsel %vm1364_vm3, %v1353_v60, 64 }
 0x48b   : > { %v1382_v12 = vsel %vm1366_vm4, %v1354_v62, 64  ;;  %vm1372_vm8 = vcmp.eq.f32.partialorder %v1321_v36, %v1349_v23  ;;  %vm1374_vm9 = vcmp.eq.f32.partialorder %v1323_v52, %v1349_v23  ;;  %vm1414_vm10 = vcmp.lt.s32.totalorder %v1376_v47, %v1380_v27 }
 0x48c   : > { %vm1406_vm7 = vcmp.lt.s32.totalorder %v1404_v25, %v1405_v31  ;;  %vm1416_vm11 = vcmp.lt.s32.totalorder %v1378_v11, %v1382_v12  ;;  %v1384_v51 = vsel %vm1368_vm5, %v1355_v0, 64  ;;  %v1386_v14 = vsel %vm1370_vm6, %v1356_v1, 64 }
 0x48d   : > { %v1407_v49 = vsel %vm1406_vm7, %v1404_v25, %v1405_v31  ;;  %v1415_v20 = vsel %vm1414_vm10, %v1376_v47, %v1380_v27  ;;  %v1417_v21 = vsel %vm1416_vm11, %v1378_v11, %v1382_v12  ;;  %v1388_v17 = vsel %vm1372_vm8, %v1357_v15, 64 }
 0x48e   : > { %v1408_v29 = vrot.slane %v1407_v49, 2  ;;  %vm1418_vm12 = vcmp.lt.s32.totalorder %v1415_v20, %v1384_v51  ;;  %vm1420_vm13 = vcmp.lt.s32.totalorder %v1417_v21, %v1386_v14  ;;  %v1390_v30 = vsel %vm1374_vm9, %v1358_v16, 64 }
 0x48f   : > { %v1419_v5 = vsel %vm1418_vm12, %v1415_v20, %v1384_v51  ;;  %v1421_v32 = vsel %vm1420_vm13, %v1417_v21, %v1386_v14  ;;  %vm1442_vm6 = vcmask 1040384   ;;  %vm1446_vm7 = vcmp.lt.s32.totalorder %v1350_v48, 256 }
 0x490   : > { %vm1422_vm14 = vcmp.lt.s32.totalorder %v1419_v5, %v1388_v17  ;;  %vm1424_vm15 = vcmp.lt.s32.totalorder %v1421_v32, %v1390_v30  ;;  %vm1409_vm0 = vcmp.lt.s32.totalorder %v1407_v49, %v1408_v29  ;;  %vm1522_vm8 = vcmask 73728  }
 0x491   : > { %v1423_v24 = vsel %vm1422_vm14, %v1419_v5, %v1388_v17  ;;  %v1425_v33 = vsel %vm1424_vm15, %v1421_v32, %v1390_v30  ;;  %v1410_v36 = vsel %vm1409_vm0, %v1407_v49, %v1408_v29 }
 0x492   : > { %vm1426_vm1 = vcmp.lt.s32.totalorder %v1423_v24, %v1425_v33  ;;  %v1411_v38 = vrot.slane %v1410_v36, 1 }
 0x493   : > { %v1427_v34 = vsel %vm1426_vm1, %v1423_v24, %v1425_v33 }
 0x494   : > { %v1428_v35 = vrot.slane %v1427_v34, 4  ;;  %vm1412_vm4 = vcmp.lt.s32.totalorder %v1410_v36, %v1411_v38 }
 0x495   : > { %v1413_v52 = vsel %vm1412_vm4, %v1410_v36, %v1411_v38 }
 0x496   : > { %vm1429_vm2 = vcmp.lt.s32.totalorder %v1427_v34, %v1428_v35  ;;  %v1439_v7 = vadd.s32 %v1438_v45, %v1413_v52 }
 0x497   : > { %v1430_v37 = vsel %vm1429_vm2, %v1427_v34, %v1428_v35 }
 0x498   : > { %v1431_v40 = vrot.slane %v1430_v37, 2 }
 0x49a   : > { %vm1432_vm3 = vcmp.lt.s32.totalorder %v1430_v37, %v1431_v40 }
 0x49b   : > { %v1433_v41 = vsel %vm1432_vm3, %v1430_v37, %v1431_v40 }
 0x49c   : > { %v1434_v8 = vrot.slane %v1433_v41, 1 }
 0x49e   : > { %vm1435_vm5 = vcmp.lt.s32.totalorder %v1433_v41, %v1434_v8 }
 0x49f   : > { %v1436_v44 = vsel %vm1435_vm5, %v1433_v41, %v1434_v8 }
 0x4a0   : > { %v1440_v50 = vadd.s32 %v1438_v45, %v1436_v44 }
 0x4a2   : > { %v1441_v53 = vrot.slane %v1440_v50, 7 }
 0x4a4   : > { %v1443_v9 = vsel %vm1442_vm6, %v1439_v7, %v1441_v53 }
 0x4a5   : > { %1448 = vst.msk [vmem:[%s3151_s20] sm:$0x3] %vm1446_vm7, %v1443_v9 }
 0x4fc   : > { %v1499_v55 = vpop.f32.mrf.mxu1 }
 0x4fd   : > { %v1500_v6 = vadd.f32 %v1499_v55, %v1481_v54 }
 0x50b   : > { %v1519_v56 = vpop.f32.mrf.mxu2 }
 0x50c   : > { %v1520_v58 = vadd.f32 %v1519_v56, %v1500_v6 }
 0x50e   : > { %v1523_v59 = vsel %vm1522_vm8, %v1520_v58, -inf }
 0x50f   : > { %1524 = vmax.xlane.f32.xlu2 %v1523_v59 }
 0x582   : > { %v1525_v48 = vpop.xlane.xlu2 %1524 }
 0x583   : > { %v1526_v60 = vsub.f32 %v1520_v58, %v1525_v48 }
 0x585   : > { %v1527_v62 = vmul.f32 1.442695, %v1526_v60 }
 0x587   : > { %2149 = vpow2.f32 %v1527_v62 }
 0x58d   : > { %v2150_v63 = vpop.eup %2149 }
 0x58e   : > { %v1529_v0 = vsel %vm1522_vm8, %v2150_v63, 0.0 }
 0x58f   : > { %1530 = vadd.xlane.f32.xlu0 %v1529_v0 }
 0x602   : > { %v1531_v1 = vpop.xlane.xlu0 %1530 }
 0x603   : > { %2151 = vlog2.f32 %v1531_v1 }
 0x609   : > { %v2152_v2 = vpop.eup %2151 }
 0x60a   : > { %v1533_v4 = vmul.f32 0.6931472, %v2152_v2 }
 0x60c   : > { %v1534_v10 = vsub.f32 %v1526_v60, %v1533_v4 }
 0x60e   : > { %v1536_v13 = vmul.f32 1.442695, %v1534_v10  ;;  %1535 = vst.msk [vmem:[%s536_s25] sm:$0x1] %vm1522_vm8, %v1534_v10 }
 0x60f   : > { %2302 = shalt.err (!%p2299_p5)
}
 0x610   : > { %2074 = dma.vmem_to_hbm [thread:$0]  (%p2544_p11), %s1560_s22, 16, %s1562_s23, %s1540_s12   ;;  %2153 = vpow2.f32 %v1536_v13 }
 0x611   : > { %s3290_s27 = sld [smem:[#allocation34_spill]]  ;;  %s542_s15 = scalar_lea.vmem [#allocation12], %s2619_s16 }
 0x612   : > { %s1572_s1 = sshll.u32 %s542_s15, 4  ;;  %s1574_s10 = sshll.u32 %s1570_s4, 4  ;;  %s1573_s1 = int_to_ptr.vmem [resolvable:$true] %s1572_s1  ;;  %s1575_s10 = int_to_ptr.hbm [resolvable:$true] %s1574_s10 }
 0x613   : > { %s1586_s24 = sshll.u32 %s3151_s20, 4  ;;  %s3292_s22 = sand.u32 1, %s2511_s29   ;;  %s3186_s24 = int_to_ptr.vmem [resolvable:$true] %s1586_s24 }
 0x614   : > { %s1544_s23 = scalar_lea.sflag [#allocation13], %s3292_s22  ;;  %s2317_s12 = sshra.s32 %s1575_s10, 4  ;;  %s2318_s12 = int_to_ptr.hbm [resolvable:$true] %s2317_s12 }
 0x615   : > { %s2323_s4 = scalar_lea.hbm %s3289_s30, 2  ;;  %p2324_p2 = scmp.lt.s32.totalorder %s2318_s12, %s3289_s30 }
 0x616   : > { %v2154_v15 = vpop.eup %2153 }
 0x617   : > { %s3291_s0 = smov %s3290_s27  ;;  %s1584_s14 = scalar_lea.hbm %s3290_s27, %s1997_s18  ;;  %1538 = vst.msk [vmem:[%s542_s15] sm:$0x1] %vm1522_vm8, %v2154_v15 }
 0x618   : > { %s1588_s17 = sshll.u32 %s1584_s14, 4  ;;  %s2319_s18 = scalar_lea.hbm %s2318_s12, 1  ;;  %s3188_s17 = int_to_ptr.hbm [resolvable:$true] %s1588_s17 }
 0x619   : > { %p2320_p9 = scmp.ne.s32.totalorder %s2318_s12, %s2319_s18  ;;  %p2325_p3 = scmp.lt.s32.totalorder %s2323_s4, %s2319_s18 }
 0x61b   : > { %p2321_p10 = pnand %p2320_p9, %p2544_p11  ;;  %p2326_p4 = por %p2325_p3, %p2324_p2 }
 0x61d   : > { %p2322_p1 = pneg %p2321_p10 }
 0x61f   : > { %p2327_p6 = pnand %p2326_p4, %p2322_p1 }
 0x621   : > { %2330 = shalt.err (!%p2327_p6)
}
 0x622   : > { %2075 = dma.vmem_to_hbm [thread:$0]  (%p2544_p11), %s1573_s1, 16, %s1575_s10, %s1544_s23  }
 0x623   : > { %s2345_s29 = sshra.s32 %s3188_s17, 4  ;;  %s2351_s14 = scalar_lea.hbm %s3291_s0, 4  ;;  %s2346_s29 = int_to_ptr.hbm [resolvable:$true] %s2345_s29 }
 0x624   : > { %s2347_s25 = scalar_lea.hbm %s2346_s29, 2  ;;  %p2352_p0 = scmp.lt.s32.totalorder %s2346_s29, %s3291_s0 }
 0x625   : > { %p2348_p13 = scmp.ne.s32.totalorder %s2346_s29, %s2347_s25  ;;  %p2353_p5 = scmp.lt.s32.totalorder %s2351_s14, %s2347_s25 }
 0x627   : > { %p2349_p7 = pnand %p2348_p13, %p2544_p11  ;;  %p2354_p9 = por %p2353_p5, %p2352_p0 }
 0x629   : > { %p2350_p8 = pneg %p2349_p7 }
 0x62b   : > { %p2355_p10 = pnand %p2354_p9, %p2350_p8 }
 0x62d   : > { %2358 = shalt.err (!%p2355_p10)
}
 0x62e   : > { %2076 = dma.vmem_to_hbm [thread:$0]  (%p2544_p11), %s3186_s24, 32, %s3188_s17, %s1544_s23  }
 0x62f PF: > { %s3293_s1 = sld [smem:[#allocation21_spill]]  ;;  %p3295_p1 = scmp.ge.s32.totalorder %s2413_s28, 2 }
 0x631   : > { %p2095_p2 = pnand %p3295_p1, %p2548_p12 }
 0x633   : > { %p2096_p3 = pneg %p2095_p2 }
 0x635   : > { %s1600_s12 = sand.u32 1, %s3293_s1  }
 0x636   : > { %s1601_s18 = scalar_lea.sflag [#allocation5], %s1600_s12 }
 0x637   : > { %2392 = dma.done.wait (%p2096_p3), %s1601_s18, 16  }
 0x638   : > { %2394 = vsyncadd (%p2096_p3), %s1601_s18, 4294967280  ;;  %s3296_s16 = sadd.s32 4294967294, %s2413_s28  }
 0x639   : > { %s1609_s20 = sand.u32 1, %s3296_s16  }
 0x63a   : > { %s1610_s4 = scalar_lea.sflag [#allocation13], %s1609_s20 }
 0x63b   : > { %2396 = dma.done.wait (%p2096_p3), %s1610_s4, 48  }
 0x63c   : > { %2398 = vsyncadd (%p2096_p3), %s1610_s4, 4294967248  ;;  %s3297_s28 = sld [smem:[#allocation23_spill]]  ;;  %s3300_s25 = smov %s2405_s26 }
 0x63d   : > { %s3298_s19 = sld [smem:[#allocation22_spill]] }
 0x63e   : > { %s3299_s27 = sld [smem:[#allocation24_spill]] }
 0x642   : > { %p34_p11 = scmp.ge.s32.totalorder %s3297_s28, 4  }
 0x643   : > { %s3301_s26 = smov %s3298_s19 }
 0x644   :  { %36 = sbr.rel (!%p34_p11) target bundleno = 19 (0x13), region = 162 }
 0x649   :  { %1625 = vsyncpa [#allocation4], 1 }
 0x64a   :  { %1627 = vsyncpa [#allocation4 + $0x1], 1 }
 0x64b   :  { %1628 = vsyncpa [#allocation7], 1 }
 0x64c   :  { %1630 = vsyncpa [#allocation7 + $0x1], 1 }
 0x64d   :  { %1631 = vsyncpa [#allocation10], 1 }
 0x64e   :  { %1632 = vsyncpa [#allocation5], 1 }
 0x64f   :  { %1634 = vsyncpa [#allocation5 + $0x1], 1 }
 0x650   :  { %1635 = vsyncpa [#allocation13], 1 }
 0x651   :  { %1637 = vsyncpa [#allocation13 + $0x1], 1 }

</bundles_post_ra>
